<compile_context>
chip_gen: v7x
topology: tpu7x:2x2x1
jax: 0.10.0
libtpu: 0.0.40
codegen_flags: <defaults>
</compile_context>

<pallas_src>
import functools
import math

import jax
import jax.numpy as jnp
import numpy as np
from jax.experimental import pallas as pl
from jax.experimental.pallas import tpu as pltpu


def _pma_kernel(*refs, num_heads, block_batch, have_mask):
    if have_mask:
        (q_ref, x_ref, wq_ref, wk_ref, wv_ref, wo_ref,
         bq_ref, bk_ref, bv_ref, bo_ref, mask_ref, o_ref, attn_scr) = refs
    else:
        (q_ref, x_ref, wq_ref, wk_ref, wv_ref, wo_ref,
         bq_ref, bk_ref, bv_ref, bo_ref, o_ref, attn_scr) = refs
        mask_ref = None

    Bt = block_batch
    H = num_heads
    Mq, E = q_ref.shape            # Mq = Bt * Sq
    Mk, _ = x_ref.shape            # Mk = Bt * Sk
    Sq = Mq // Bt
    Sk = Mk // Bt
    Dh = E // H

    # QKV projections on flattened (Bt*S, E) activation slabs.  Weights arrive
    # pre-transposed ((E, E), ready for x @ W^T) and pre-cast to bf16; the
    # 1/sqrt(Dh) scale is already folded into wq / bq by the wrapper.
    q_in = q_ref[...].astype(jnp.bfloat16)
    x_in = x_ref[...].astype(jnp.bfloat16)

    q = jnp.dot(q_in, wq_ref[...], preferred_element_type=jnp.float32) + bq_ref[...]
    k = jnp.dot(x_in, wk_ref[...], preferred_element_type=jnp.float32) + bk_ref[...]
    v = jnp.dot(x_in, wv_ref[...], preferred_element_type=jnp.float32) + bv_ref[...]

    q_bf = q.astype(jnp.bfloat16)
    k_bf = k.astype(jnp.bfloat16)
    v_bf = v.astype(jnp.bfloat16)

    if have_mask:
        add_mask = mask_ref[...].astype(jnp.float32)       # (Bt, Sk) additive

    # Per (batch-in-block, head) attention; Bt and H are small static ints.
    for b in range(Bt):
        r0 = b * Sq
        s0 = b * Sk
        for h in range(H):
            lo = h * Dh
            qh = q_bf[r0:r0 + Sq, lo:lo + Dh]              # (Sq, Dh)
            kh = k_bf[s0:s0 + Sk, lo:lo + Dh]              # (Sk, Dh)
            vh = v_bf[s0:s0 + Sk, lo:lo + Dh]              # (Sk, Dh)

            # Contract the last dims of both operands: no K^T materialized.
            s = jnp.einsum("qd,kd->qk", qh, kh,
                           preferred_element_type=jnp.float32)   # (Sq, Sk) f32
            if have_mask:
                s = s + add_mask[b:b + 1, :]               # broadcast (1, Sk)

            # f32 softmax math; normalize AFTER P@V so the divide touches the
            # (Sq, Dh) tile instead of (Sq, Sk).
            m = jnp.max(s, axis=-1, keepdims=True)
            p = jnp.exp(s - m)
            denom = jnp.sum(p, axis=-1, keepdims=True)

            oh = jnp.einsum("qk,kd->qd", p.astype(jnp.bfloat16), vh,
                            preferred_element_type=jnp.float32)  # (Sq, Dh) f32
            oh = oh * pl.reciprocal(denom, approx=True)

            # Static-offset store into VMEM scratch: no concatenate.
            attn_scr[r0:r0 + Sq, lo:lo + Dh] = oh

    # Output projection on the dense (Bt*Sq, E) slab.
    attn = attn_scr[...].astype(jnp.bfloat16)
    y = jnp.dot(attn, wo_ref[...], preferred_element_type=jnp.float32) + bo_ref[...]
    o_ref[...] = y.astype(o_ref.dtype)


def pma_forward(q, x, params, key_padding_mask=None, *, num_heads, block_batch=1):
    """Pallas PMAWithQuery.forward(Q, X, key_padding_mask), batch_first layout.

    q: (B, Sq, E) queries.  x: (B, Sk, E) keys/values.
    key_padding_mask: (B, Sk) bool (True = ignore) or float additive, or None.
    """
    B, Sq, E = q.shape
    Bx, Sk, Ex = x.shape
    assert Bx == B and Ex == E
    assert E % num_heads == 0
    assert B % block_batch == 0
    Bt = block_batch
    head_dim = E // num_heads
    scale = 1.0 / math.sqrt(head_dim)

    w_in = params["in_proj_weight"]                        # (3E, E)
    b_in = params["in_proj_bias"]                          # (3E,)

    # Split W_in, fold the softmax scale into the Q projection, pre-transpose
    # (kernel computes x @ W^T with no in-kernel .T) and pre-cast to bf16.
    wq_t = (w_in[:E] * scale).T.astype(jnp.bfloat16)       # (E, E)
    wk_t = w_in[E:2 * E].T.astype(jnp.bfloat16)            # (E, E)
    wv_t = w_in[2 * E:].T.astype(jnp.bfloat16)             # (E, E)
    wo_t = params["out_proj_weight"].T.astype(jnp.bfloat16)  # (E, E)
    bq = (b_in[:E] * scale).reshape(1, E).astype(jnp.float32)
    bk = b_in[E:2 * E].reshape(1, E).astype(jnp.float32)
    bv = b_in[2 * E:].reshape(1, E).astype(jnp.float32)
    bo = params["out_proj_bias"].reshape(1, E).astype(jnp.float32)

    # Flatten (B, S, E) -> (B*S, E) in XLA so the in-kernel projections see
    # M = Bt*S rows and the output store is a dense 2-D slab.
    q2 = q.reshape(B * Sq, E)
    x2 = x.reshape(B * Sk, E)

    have_mask = key_padding_mask is not None
    inputs = [q2, x2, wq_t, wk_t, wv_t, wo_t, bq, bk, bv, bo]
    in_specs = [
        pl.BlockSpec((Bt * Sq, E), lambda b: (b, 0)),      # Q rows
        pl.BlockSpec((Bt * Sk, E), lambda b: (b, 0)),      # X rows
        pl.BlockSpec((E, E), lambda b: (0, 0)),            # Wq^T (constant)
        pl.BlockSpec((E, E), lambda b: (0, 0)),            # Wk^T (constant)
        pl.BlockSpec((E, E), lambda b: (0, 0)),            # Wv^T (constant)
        pl.BlockSpec((E, E), lambda b: (0, 0)),            # Wo^T (constant)
        pl.BlockSpec((1, E), lambda b: (0, 0)),            # bq
        pl.BlockSpec((1, E), lambda b: (0, 0)),            # bk
        pl.BlockSpec((1, E), lambda b: (0, 0)),            # bv
        pl.BlockSpec((1, E), lambda b: (0, 0)),            # bo
    ]
    if have_mask:
        if key_padding_mask.dtype == jnp.bool_:
            # True == ignore (PyTorch convention).  Fully-masked rows give NaN,
            # matching default nn.MultiheadAttention.
            mask = jnp.where(key_padding_mask, -jnp.inf, 0.0).astype(jnp.float32)
        else:
            mask = key_padding_mask.astype(jnp.float32)
        inputs.append(mask)
        in_specs.append(pl.BlockSpec((Bt, Sk), lambda b: (b, 0)))

    kernel = functools.partial(_pma_kernel, num_heads=num_heads,
                               block_batch=Bt, have_mask=have_mask)

    out2 = pl.pallas_call(
        kernel,
        out_shape=jax.ShapeDtypeStruct((B * Sq, E), q.dtype),
        grid_spec=pltpu.PrefetchScalarGridSpec(
            num_scalar_prefetch=0,
            grid=(B // Bt,),
            in_specs=in_specs,
            out_specs=pl.BlockSpec((Bt * Sq, E), lambda b: (b, 0)),
            scratch_shapes=[pltpu.VMEM((Bt * Sq, E), jnp.float32)],
        ),
        compiler_params=pltpu.CompilerParams(
            dimension_semantics=("parallel",),
            vmem_limit_bytes=64 * 1024 * 1024,
        ),
    )(*inputs)
    return out2.reshape(B, Sq, E)


def pma_reference(q, x, params, key_padding_mask=None, *, num_heads):
    """Pure-JAX (f32) reference mirroring nn.MultiheadAttention(Q, X, X)."""
    B, Sq, E = q.shape
    _, Sk, _ = x.shape
    Dh = E // num_heads
    w_in, b_in = params["in_proj_weight"], params["in_proj_bias"]
    wq, wk, wv = w_in[:E], w_in[E:2 * E], w_in[2 * E:]
    bq, bk, bv = b_in[:E], b_in[E:2 * E], b_in[2 * E:]

    qp = jnp.einsum("bse,fe->bsf", q, wq) + bq
    kp = jnp.einsum("bse,fe->bsf", x, wk) + bk
    vp = jnp.einsum("bse,fe->bsf", x, wv) + bv

    def heads(t, S):
        return t.reshape(B, S, num_heads, Dh).transpose(0, 2, 1, 3)

    qh, kh, vh = heads(qp, Sq), heads(kp, Sk), heads(vp, Sk)
    scores = jnp.einsum("bhqd,bhkd->bhqk", qh, kh) / math.sqrt(Dh)
    if key_padding_mask is not None:
        if key_padding_mask.dtype == jnp.bool_:
            add = jnp.where(key_padding_mask, -jnp.inf, 0.0)
        else:
            add = key_padding_mask
        scores = scores + add[:, None, None, :].astype(scores.dtype)
    p = jax.nn.softmax(scores, axis=-1)
    o = jnp.einsum("bhqk,bhkd->bhqd", p, vh).transpose(0, 2, 1, 3).reshape(B, Sq, E)
    return jnp.einsum("bse,fe->bsf", o, params["out_proj_weight"]) + params["out_proj_bias"]


def init_params(key, embed_dim):
    """Deterministic synthetic init matching nn.MultiheadAttention shapes."""
    k1, k2, k3, k4 = jax.random.split(key, 4)
    lim_in = math.sqrt(6.0 / (embed_dim + 3 * embed_dim))
    lim_out = math.sqrt(1.0 / embed_dim)
    return {
        "in_proj_weight": jax.random.uniform(
            k1, (3 * embed_dim, embed_dim), jnp.float32, -lim_in, lim_in),
        "in_proj_bias": jax.random.uniform(
            k2, (3 * embed_dim,), jnp.float32, -0.1, 0.1),
        "out_proj_weight": jax.random.uniform(
            k3, (embed_dim, embed_dim), jnp.float32, -lim_out, lim_out),
        "out_proj_bias": jax.random.uniform(
            k4, (embed_dim,), jnp.float32, -0.1, 0.1),
    }


if __name__ == "__main__":
    B, Sq, Sk, E, H = 2, 8, 16, 32, 4

    key = jax.random.PRNGKey(0)
    kq, kx, kp = jax.random.split(key, 3)
    Q = jax.random.normal(kq, (B, Sq, E), jnp.float32)     # external queries
    X = jax.random.normal(kx, (B, Sk, E), jnp.float32)     # set elements
    params = init_params(kp, E)

    # 1) key_padding_mask=None path, two batch elements per grid step
    #    (flattened M = Bt*S rows per projection matmul, no mask DMA/add).
    out = pma_forward(Q, X, params, key_padding_mask=None,
                      num_heads=H, block_batch=2)
    out = jax.block_until_ready(out)
    ref = pma_reference(Q, X, params, None, num_heads=H)
    np.testing.assert_allclose(np.asarray(out), np.asarray(ref),
                               rtol=2e-2, atol=2e-2)

    # 2) bool key_padding_mask path, one batch element per (parallel) grid step
    #    (2 grid steps -> both TensorCores on v7x).
    kpm = jnp.zeros((B, Sk), jnp.bool_).at[1, Sk - 4:].set(True)
    out_m = pma_forward(Q, X, params, key_padding_mask=kpm,
                        num_heads=H, block_batch=1)
    out_m = jax.block_until_ready(out_m)
    ref_m = pma_reference(Q, X, params, kpm, num_heads=H)
    np.testing.assert_allclose(np.asarray(out_m), np.asarray(ref_m),
                               rtol=2e-2, atol=2e-2)

    print("KERNEL_OK")
</pallas_src>

<mosaic_0001>
module attributes {stable_mosaic.version = 11 : i64} {
  func.func @_pma_kernel(%arg0: i32, %arg1: memref<16x32xf32, #tpu.memory_space<vmem>>, %arg2: memref<32x32xf32, #tpu.memory_space<vmem>>, %arg3: memref<32x32xbf16, #tpu.memory_space<vmem>>, %arg4: memref<32x32xbf16, #tpu.memory_space<vmem>>, %arg5: memref<32x32xbf16, #tpu.memory_space<vmem>>, %arg6: memref<32x32xbf16, #tpu.memory_space<vmem>>, %arg7: memref<1x32xf32, #tpu.memory_space<vmem>>, %arg8: memref<1x32xf32, #tpu.memory_space<vmem>>, %arg9: memref<1x32xf32, #tpu.memory_space<vmem>>, %arg10: memref<1x32xf32, #tpu.memory_space<vmem>>, %arg11: memref<16x32xf32, #tpu.memory_space<vmem>>, %arg12: memref<16x32xf32, #tpu.memory_space<vmem>>) attributes {dimension_semantics = [#tpu.dimension_semantics<parallel>], iteration_bounds = array<i64: 1>, scalar_prefetch = 0 : i64, scratch_operands = 1 : i64, tpu.core_type = #tpu.core_type<tc>, window_params = [{transform_indices = @transform_0, window_bounds = array<i64: 16, 32>}, {transform_indices = @transform_1, window_bounds = array<i64: 32, 32>}, {pipeline_mode = #tpu.pipeline_mode<synchronous>, transform_indices = @transform_2, window_bounds = array<i64: 32, 32>}, {pipeline_mode = #tpu.pipeline_mode<synchronous>, transform_indices = @transform_3, window_bounds = array<i64: 32, 32>}, {pipeline_mode = #tpu.pipeline_mode<synchronous>, transform_indices = @transform_4, window_bounds = array<i64: 32, 32>}, {pipeline_mode = #tpu.pipeline_mode<synchronous>, transform_indices = @transform_5, window_bounds = array<i64: 32, 32>}, {pipeline_mode = #tpu.pipeline_mode<synchronous>, transform_indices = @transform_6, window_bounds = array<i64: 1, 32>}, {pipeline_mode = #tpu.pipeline_mode<synchronous>, transform_indices = @transform_7, window_bounds = array<i64: 1, 32>}, {pipeline_mode = #tpu.pipeline_mode<synchronous>, transform_indices = @transform_8, window_bounds = array<i64: 1, 32>}, {pipeline_mode = #tpu.pipeline_mode<synchronous>, transform_indices = @transform_9, window_bounds = array<i64: 1, 32>}, {transform_indices = @transform_10, window_bounds = array<i64: 16, 32>}]} {
    %c0 = arith.constant 0 : index
    %c0_0 = arith.constant 0 : index
    %0 = vector.load %arg1[%c0, %c0_0] : memref<16x32xf32, #tpu.memory_space<vmem>>, vector<16x32xf32>
    %1 = arith.truncf %0 : vector<16x32xf32> to vector<16x32xbf16>
    %c0_1 = arith.constant 0 : index
    %c0_2 = arith.constant 0 : index
    %2 = vector.load %arg2[%c0_1, %c0_2] : memref<32x32xf32, #tpu.memory_space<vmem>>, vector<32x32xf32>
    %3 = arith.truncf %2 : vector<32x32xf32> to vector<32x32xbf16>
    %c0_3 = arith.constant 0 : index
    %c0_4 = arith.constant 0 : index
    %4 = vector.load %arg3[%c0_3, %c0_4] : memref<32x32xbf16, #tpu.memory_space<vmem>>, vector<32x32xbf16>
    %cst = arith.constant dense<0.000000e+00> : vector<16x32xf32>
    %5 = tpu.matmul %1, %4, %cst {dimension_numbers = #tpu.dot_dimension_numbers<[1], [0], [0], [1], [0, 0, 1, 1], [], []>} : vector<16x32xbf16>, vector<32x32xbf16>, vector<16x32xf32> -> vector<16x32xf32>
    %c0_5 = arith.constant 0 : index
    %c0_6 = arith.constant 0 : index
    %6 = vector.load %arg7[%c0_5, %c0_6] : memref<1x32xf32, #tpu.memory_space<vmem>>, vector<1x32xf32>
    %7 = vector.broadcast %6 : vector<1x32xf32> to vector<16x32xf32>
    %8 = arith.addf %5, %7 : vector<16x32xf32>
    %c0_7 = arith.constant 0 : index
    %c0_8 = arith.constant 0 : index
    %9 = vector.load %arg4[%c0_7, %c0_8] : memref<32x32xbf16, #tpu.memory_space<vmem>>, vector<32x32xbf16>
    %cst_9 = arith.constant dense<0.000000e+00> : vector<32x32xf32>
    %10 = tpu.matmul %3, %9, %cst_9 {dimension_numbers = #tpu.dot_dimension_numbers<[1], [0], [0], [1], [0, 0, 1, 1], [], []>} : vector<32x32xbf16>, vector<32x32xbf16>, vector<32x32xf32> -> vector<32x32xf32>
    %c0_10 = arith.constant 0 : index
    %c0_11 = arith.constant 0 : index
    %11 = vector.load %arg8[%c0_10, %c0_11] : memref<1x32xf32, #tpu.memory_space<vmem>>, vector<1x32xf32>
    %12 = vector.broadcast %11 : vector<1x32xf32> to vector<32x32xf32>
    %13 = arith.addf %10, %12 : vector<32x32xf32>
    %c0_12 = arith.constant 0 : index
    %c0_13 = arith.constant 0 : index
    %14 = vector.load %arg5[%c0_12, %c0_13] : memref<32x32xbf16, #tpu.memory_space<vmem>>, vector<32x32xbf16>
    %cst_14 = arith.constant dense<0.000000e+00> : vector<32x32xf32>
    %15 = tpu.matmul %3, %14, %cst_14 {dimension_numbers = #tpu.dot_dimension_numbers<[1], [0], [0], [1], [0, 0, 1, 1], [], []>} : vector<32x32xbf16>, vector<32x32xbf16>, vector<32x32xf32> -> vector<32x32xf32>
    %c0_15 = arith.constant 0 : index
    %c0_16 = arith.constant 0 : index
    %16 = vector.load %arg9[%c0_15, %c0_16] : memref<1x32xf32, #tpu.memory_space<vmem>>, vector<1x32xf32>
    %17 = vector.broadcast %16 : vector<1x32xf32> to vector<32x32xf32>
    %18 = arith.addf %15, %17 : vector<32x32xf32>
    %19 = arith.truncf %8 : vector<16x32xf32> to vector<16x32xbf16>
    %20 = arith.truncf %13 : vector<32x32xf32> to vector<32x32xbf16>
    %21 = arith.truncf %18 : vector<32x32xf32> to vector<32x32xbf16>
    %22 = vector.extract_strided_slice %19 {offsets = [0, 0], sizes = [8, 8], strides = [1, 1]} : vector<16x32xbf16> to vector<8x8xbf16>
    %23 = vector.extract_strided_slice %20 {offsets = [0, 0], sizes = [16, 8], strides = [1, 1]} : vector<32x32xbf16> to vector<16x8xbf16>
    %24 = vector.extract_strided_slice %21 {offsets = [0, 0], sizes = [16, 8], strides = [1, 1]} : vector<32x32xbf16> to vector<16x8xbf16>
    "tpu.trace_start"() <{level = 10 : i32, message = "qd,kd->qk"}> : () -> ()
    %cst_17 = arith.constant dense<0.000000e+00> : vector<8x16xf32>
    %25 = tpu.matmul %22, %23, %cst_17 {dimension_numbers = #tpu.dot_dimension_numbers<[1], [1], [0], [0], [0, 0, 1, 0], [], []>} : vector<8x8xbf16>, vector<16x8xbf16>, vector<8x16xf32> -> vector<8x16xf32>
    "tpu.trace_stop"() : () -> ()
    %cst_18 = arith.constant dense<0xFF800000> : vector<8xf32>
    %26 = vector.multi_reduction <maximumf>, %25, %cst_18 [1] : vector<8x16xf32> to vector<8xf32>
    %27 = vector.shape_cast %26 : vector<8xf32> to vector<8x1xf32>
    %28 = vector.broadcast %27 : vector<8x1xf32> to vector<8x16xf32>
    %29 = arith.subf %25, %28 : vector<8x16xf32>
    %30 = math.exp %29 : vector<8x16xf32>
    %cst_19 = arith.constant dense<0.000000e+00> : vector<8xf32>
    %31 = vector.multi_reduction <add>, %30, %cst_19 [1] : vector<8x16xf32> to vector<8xf32>
    %32 = vector.shape_cast %31 : vector<8xf32> to vector<8x1xf32>
    %33 = arith.truncf %30 : vector<8x16xf32> to vector<8x16xbf16>
    "tpu.trace_start"() <{level = 10 : i32, message = "qk,kd->qd"}> : () -> ()
    %cst_20 = arith.constant dense<0.000000e+00> : vector<8x8xf32>
    %34 = tpu.matmul %33, %24, %cst_20 {dimension_numbers = #tpu.dot_dimension_numbers<[1], [0], [0], [1], [0, 0, 1, 1], [], []>} : vector<8x16xbf16>, vector<16x8xbf16>, vector<8x8xf32> -> vector<8x8xf32>
    "tpu.trace_stop"() : () -> ()
    %35 = tpu.reciprocal %32 {approx = true} : vector<8x1xf32> -> vector<8x1xf32>
    %36 = vector.broadcast %35 : vector<8x1xf32> to vector<8x8xf32>
    %37 = arith.mulf %34, %36 : vector<8x8xf32>
    %c0_21 = arith.constant 0 : index
    %c0_22 = arith.constant 0 : index
    %38 = vector.load %arg12[%c0_21, %c0_22] : memref<16x32xf32, #tpu.memory_space<vmem>>, vector<8x8xf32>
    tpu.vector_store %arg12[%c0_21, %c0_22], %37 {strides = array<i32>} : memref<16x32xf32, #tpu.memory_space<vmem>>, vector<8x8xf32>,
    %39 = vector.extract_strided_slice %19 {offsets = [0, 8], sizes = [8, 8], strides = [1, 1]} : vector<16x32xbf16> to vector<8x8xbf16>
    %40 = vector.extract_strided_slice %20 {offsets = [0, 8], sizes = [16, 8], strides = [1, 1]} : vector<32x32xbf16> to vector<16x8xbf16>
    %41 = vector.extract_strided_slice %21 {offsets = [0, 8], sizes = [16, 8], strides = [1, 1]} : vector<32x32xbf16> to vector<16x8xbf16>
    "tpu.trace_start"() <{level = 10 : i32, message = "qd,kd->qk"}> : () -> ()
    %cst_23 = arith.constant dense<0.000000e+00> : vector<8x16xf32>
    %42 = tpu.matmul %39, %40, %cst_23 {dimension_numbers = #tpu.dot_dimension_numbers<[1], [1], [0], [0], [0, 0, 1, 0], [], []>} : vector<8x8xbf16>, vector<16x8xbf16>, vector<8x16xf32> -> vector<8x16xf32>
    "tpu.trace_stop"() : () -> ()
    %cst_24 = arith.constant dense<0xFF800000> : vector<8xf32>
    %43 = vector.multi_reduction <maximumf>, %42, %cst_24 [1] : vector<8x16xf32> to vector<8xf32>
    %44 = vector.shape_cast %43 : vector<8xf32> to vector<8x1xf32>
    %45 = vector.broadcast %44 : vector<8x1xf32> to vector<8x16xf32>
    %46 = arith.subf %42, %45 : vector<8x16xf32>
    %47 = math.exp %46 : vector<8x16xf32>
    %cst_25 = arith.constant dense<0.000000e+00> : vector<8xf32>
    %48 = vector.multi_reduction <add>, %47, %cst_25 [1] : vector<8x16xf32> to vector<8xf32>
    %49 = vector.shape_cast %48 : vector<8xf32> to vector<8x1xf32>
    %50 = arith.truncf %47 : vector<8x16xf32> to vector<8x16xbf16>
    "tpu.trace_start"() <{level = 10 : i32, message = "qk,kd->qd"}> : () -> ()
    %cst_26 = arith.constant dense<0.000000e+00> : vector<8x8xf32>
    %51 = tpu.matmul %50, %41, %cst_26 {dimension_numbers = #tpu.dot_dimension_numbers<[1], [0], [0], [1], [0, 0, 1, 1], [], []>} : vector<8x16xbf16>, vector<16x8xbf16>, vector<8x8xf32> -> vector<8x8xf32>
    "tpu.trace_stop"() : () -> ()
    %52 = tpu.reciprocal %49 {approx = true} : vector<8x1xf32> -> vector<8x1xf32>
    %53 = vector.broadcast %52 : vector<8x1xf32> to vector<8x8xf32>
    %54 = arith.mulf %51, %53 : vector<8x8xf32>
    %c0_27 = arith.constant 0 : index
    %c8 = arith.constant 8 : index
    %55 = vector.load %arg12[%c0_27, %c8] : memref<16x32xf32, #tpu.memory_space<vmem>>, vector<8x8xf32>
    tpu.vector_store %arg12[%c0_27, %c8], %54 {strides = array<i32>} : memref<16x32xf32, #tpu.memory_space<vmem>>, vector<8x8xf32>,
    %56 = vector.extract_strided_slice %19 {offsets = [0, 16], sizes = [8, 8], strides = [1, 1]} : vector<16x32xbf16> to vector<8x8xbf16>
    %57 = vector.extract_strided_slice %20 {offsets = [0, 16], sizes = [16, 8], strides = [1, 1]} : vector<32x32xbf16> to vector<16x8xbf16>
    %58 = vector.extract_strided_slice %21 {offsets = [0, 16], sizes = [16, 8], strides = [1, 1]} : vector<32x32xbf16> to vector<16x8xbf16>
    "tpu.trace_start"() <{level = 10 : i32, message = "qd,kd->qk"}> : () -> ()
    %cst_28 = arith.constant dense<0.000000e+00> : vector<8x16xf32>
    %59 = tpu.matmul %56, %57, %cst_28 {dimension_numbers = #tpu.dot_dimension_numbers<[1], [1], [0], [0], [0, 0, 1, 0], [], []>} : vector<8x8xbf16>, vector<16x8xbf16>, vector<8x16xf32> -> vector<8x16xf32>
    "tpu.trace_stop"() : () -> ()
    %cst_29 = arith.constant dense<0xFF800000> : vector<8xf32>
    %60 = vector.multi_reduction <maximumf>, %59, %cst_29 [1] : vector<8x16xf32> to vector<8xf32>
    %61 = vector.shape_cast %60 : vector<8xf32> to vector<8x1xf32>
    %62 = vector.broadcast %61 : vector<8x1xf32> to vector<8x16xf32>
    %63 = arith.subf %59, %62 : vector<8x16xf32>
    %64 = math.exp %63 : vector<8x16xf32>
    %cst_30 = arith.constant dense<0.000000e+00> : vector<8xf32>
    %65 = vector.multi_reduction <add>, %64, %cst_30 [1] : vector<8x16xf32> to vector<8xf32>
    %66 = vector.shape_cast %65 : vector<8xf32> to vector<8x1xf32>
    %67 = arith.truncf %64 : vector<8x16xf32> to vector<8x16xbf16>
    "tpu.trace_start"() <{level = 10 : i32, message = "qk,kd->qd"}> : () -> ()
    %cst_31 = arith.constant dense<0.000000e+00> : vector<8x8xf32>
    %68 = tpu.matmul %67, %58, %cst_31 {dimension_numbers = #tpu.dot_dimension_numbers<[1], [0], [0], [1], [0, 0, 1, 1], [], []>} : vector<8x16xbf16>, vector<16x8xbf16>, vector<8x8xf32> -> vector<8x8xf32>
    "tpu.trace_stop"() : () -> ()
    %69 = tpu.reciprocal %66 {approx = true} : vector<8x1xf32> -> vector<8x1xf32>
    %70 = vector.broadcast %69 : vector<8x1xf32> to vector<8x8xf32>
    %71 = arith.mulf %68, %70 : vector<8x8xf32>
    %c0_32 = arith.constant 0 : index
    %c16 = arith.constant 16 : index
    %72 = vector.load %arg12[%c0_32, %c16] : memref<16x32xf32, #tpu.memory_space<vmem>>, vector<8x8xf32>
    tpu.vector_store %arg12[%c0_32, %c16], %71 {strides = array<i32>} : memref<16x32xf32, #tpu.memory_space<vmem>>, vector<8x8xf32>,
    %73 = vector.extract_strided_slice %19 {offsets = [0, 24], sizes = [8, 8], strides = [1, 1]} : vector<16x32xbf16> to vector<8x8xbf16>
    %74 = vector.extract_strided_slice %20 {offsets = [0, 24], sizes = [16, 8], strides = [1, 1]} : vector<32x32xbf16> to vector<16x8xbf16>
    %75 = vector.extract_strided_slice %21 {offsets = [0, 24], sizes = [16, 8], strides = [1, 1]} : vector<32x32xbf16> to vector<16x8xbf16>
    "tpu.trace_start"() <{level = 10 : i32, message = "qd,kd->qk"}> : () -> ()
    %cst_33 = arith.constant dense<0.000000e+00> : vector<8x16xf32>
    %76 = tpu.matmul %73, %74, %cst_33 {dimension_numbers = #tpu.dot_dimension_numbers<[1], [1], [0], [0], [0, 0, 1, 0], [], []>} : vector<8x8xbf16>, vector<16x8xbf16>, vector<8x16xf32> -> vector<8x16xf32>
    "tpu.trace_stop"() : () -> ()
    %cst_34 = arith.constant dense<0xFF800000> : vector<8xf32>
    %77 = vector.multi_reduction <maximumf>, %76, %cst_34 [1] : vector<8x16xf32> to vector<8xf32>
    %78 = vector.shape_cast %77 : vector<8xf32> to vector<8x1xf32>
    %79 = vector.broadcast %78 : vector<8x1xf32> to vector<8x16xf32>
    %80 = arith.subf %76, %79 : vector<8x16xf32>
    %81 = math.exp %80 : vector<8x16xf32>
    %cst_35 = arith.constant dense<0.000000e+00> : vector<8xf32>
    %82 = vector.multi_reduction <add>, %81, %cst_35 [1] : vector<8x16xf32> to vector<8xf32>
    %83 = vector.shape_cast %82 : vector<8xf32> to vector<8x1xf32>
    %84 = arith.truncf %81 : vector<8x16xf32> to vector<8x16xbf16>
    "tpu.trace_start"() <{level = 10 : i32, message = "qk,kd->qd"}> : () -> ()
    %cst_36 = arith.constant dense<0.000000e+00> : vector<8x8xf32>
    %85 = tpu.matmul %84, %75, %cst_36 {dimension_numbers = #tpu.dot_dimension_numbers<[1], [0], [0], [1], [0, 0, 1, 1], [], []>} : vector<8x16xbf16>, vector<16x8xbf16>, vector<8x8xf32> -> vector<8x8xf32>
    "tpu.trace_stop"() : () -> ()
    %86 = tpu.reciprocal %83 {approx = true} : vector<8x1xf32> -> vector<8x1xf32>
    %87 = vector.broadcast %86 : vector<8x1xf32> to vector<8x8xf32>
    %88 = arith.mulf %85, %87 : vector<8x8xf32>
    %c0_37 = arith.constant 0 : index
    %c24 = arith.constant 24 : index
    %89 = vector.load %arg12[%c0_37, %c24] : memref<16x32xf32, #tpu.memory_space<vmem>>, vector<8x8xf32>
    tpu.vector_store %arg12[%c0_37, %c24], %88 {strides = array<i32>} : memref<16x32xf32, #tpu.memory_space<vmem>>, vector<8x8xf32>,
    %90 = vector.extract_strided_slice %19 {offsets = [8, 0], sizes = [8, 8], strides = [1, 1]} : vector<16x32xbf16> to vector<8x8xbf16>
    %91 = vector.extract_strided_slice %20 {offsets = [16, 0], sizes = [16, 8], strides = [1, 1]} : vector<32x32xbf16> to vector<16x8xbf16>
    %92 = vector.extract_strided_slice %21 {offsets = [16, 0], sizes = [16, 8], strides = [1, 1]} : vector<32x32xbf16> to vector<16x8xbf16>
    "tpu.trace_start"() <{level = 10 : i32, message = "qd,kd->qk"}> : () -> ()
    %cst_38 = arith.constant dense<0.000000e+00> : vector<8x16xf32>
    %93 = tpu.matmul %90, %91, %cst_38 {dimension_numbers = #tpu.dot_dimension_numbers<[1], [1], [0], [0], [0, 0, 1, 0], [], []>} : vector<8x8xbf16>, vector<16x8xbf16>, vector<8x16xf32> -> vector<8x16xf32>
    "tpu.trace_stop"() : () -> ()
    %cst_39 = arith.constant dense<0xFF800000> : vector<8xf32>
    %94 = vector.multi_reduction <maximumf>, %93, %cst_39 [1] : vector<8x16xf32> to vector<8xf32>
    %95 = vector.shape_cast %94 : vector<8xf32> to vector<8x1xf32>
    %96 = vector.broadcast %95 : vector<8x1xf32> to vector<8x16xf32>
    %97 = arith.subf %93, %96 : vector<8x16xf32>
    %98 = math.exp %97 : vector<8x16xf32>
    %cst_40 = arith.constant dense<0.000000e+00> : vector<8xf32>
    %99 = vector.multi_reduction <add>, %98, %cst_40 [1] : vector<8x16xf32> to vector<8xf32>
    %100 = vector.shape_cast %99 : vector<8xf32> to vector<8x1xf32>
    %101 = arith.truncf %98 : vector<8x16xf32> to vector<8x16xbf16>
    "tpu.trace_start"() <{level = 10 : i32, message = "qk,kd->qd"}> : () -> ()
    %cst_41 = arith.constant dense<0.000000e+00> : vector<8x8xf32>
    %102 = tpu.matmul %101, %92, %cst_41 {dimension_numbers = #tpu.dot_dimension_numbers<[1], [0], [0], [1], [0, 0, 1, 1], [], []>} : vector<8x16xbf16>, vector<16x8xbf16>, vector<8x8xf32> -> vector<8x8xf32>
    "tpu.trace_stop"() : () -> ()
    %103 = tpu.reciprocal %100 {approx = true} : vector<8x1xf32> -> vector<8x1xf32>
    %104 = vector.broadcast %103 : vector<8x1xf32> to vector<8x8xf32>
    %105 = arith.mulf %102, %104 : vector<8x8xf32>
    %c8_42 = arith.constant 8 : index
    %c0_43 = arith.constant 0 : index
    %106 = vector.load %arg12[%c8_42, %c0_43] : memref<16x32xf32, #tpu.memory_space<vmem>>, vector<8x8xf32>
    tpu.vector_store %arg12[%c8_42, %c0_43], %105 {strides = array<i32>} : memref<16x32xf32, #tpu.memory_space<vmem>>, vector<8x8xf32>,
    %107 = vector.extract_strided_slice %19 {offsets = [8, 8], sizes = [8, 8], strides = [1, 1]} : vector<16x32xbf16> to vector<8x8xbf16>
    %108 = vector.extract_strided_slice %20 {offsets = [16, 8], sizes = [16, 8], strides = [1, 1]} : vector<32x32xbf16> to vector<16x8xbf16>
    %109 = vector.extract_strided_slice %21 {offsets = [16, 8], sizes = [16, 8], strides = [1, 1]} : vector<32x32xbf16> to vector<16x8xbf16>
    "tpu.trace_start"() <{level = 10 : i32, message = "qd,kd->qk"}> : () -> ()
    %cst_44 = arith.constant dense<0.000000e+00> : vector<8x16xf32>
    %110 = tpu.matmul %107, %108, %cst_44 {dimension_numbers = #tpu.dot_dimension_numbers<[1], [1], [0], [0], [0, 0, 1, 0], [], []>} : vector<8x8xbf16>, vector<16x8xbf16>, vector<8x16xf32> -> vector<8x16xf32>
    "tpu.trace_stop"() : () -> ()
    %cst_45 = arith.constant dense<0xFF800000> : vector<8xf32>
    %111 = vector.multi_reduction <maximumf>, %110, %cst_45 [1] : vector<8x16xf32> to vector<8xf32>
    %112 = vector.shape_cast %111 : vector<8xf32> to vector<8x1xf32>
    %113 = vector.broadcast %112 : vector<8x1xf32> to vector<8x16xf32>
    %114 = arith.subf %110, %113 : vector<8x16xf32>
    %115 = math.exp %114 : vector<8x16xf32>
    %cst_46 = arith.constant dense<0.000000e+00> : vector<8xf32>
    %116 = vector.multi_reduction <add>, %115, %cst_46 [1] : vector<8x16xf32> to vector<8xf32>
    %117 = vector.shape_cast %116 : vector<8xf32> to vector<8x1xf32>
    %118 = arith.truncf %115 : vector<8x16xf32> to vector<8x16xbf16>
    "tpu.trace_start"() <{level = 10 : i32, message = "qk,kd->qd"}> : () -> ()
    %cst_47 = arith.constant dense<0.000000e+00> : vector<8x8xf32>
    %119 = tpu.matmul %118, %109, %cst_47 {dimension_numbers = #tpu.dot_dimension_numbers<[1], [0], [0], [1], [0, 0, 1, 1], [], []>} : vector<8x16xbf16>, vector<16x8xbf16>, vector<8x8xf32> -> vector<8x8xf32>
    "tpu.trace_stop"() : () -> ()
    %120 = tpu.reciprocal %117 {approx = true} : vector<8x1xf32> -> vector<8x1xf32>
    %121 = vector.broadcast %120 : vector<8x1xf32> to vector<8x8xf32>
    %122 = arith.mulf %119, %121 : vector<8x8xf32>
    %c8_48 = arith.constant 8 : index
    %c8_49 = arith.constant 8 : index
    %123 = vector.load %arg12[%c8_48, %c8_49] : memref<16x32xf32, #tpu.memory_space<vmem>>, vector<8x8xf32>
    tpu.vector_store %arg12[%c8_48, %c8_49], %122 {strides = array<i32>} : memref<16x32xf32, #tpu.memory_space<vmem>>, vector<8x8xf32>,
    %124 = vector.extract_strided_slice %19 {offsets = [8, 16], sizes = [8, 8], strides = [1, 1]} : vector<16x32xbf16> to vector<8x8xbf16>
    %125 = vector.extract_strided_slice %20 {offsets = [16, 16], sizes = [16, 8], strides = [1, 1]} : vector<32x32xbf16> to vector<16x8xbf16>
    %126 = vector.extract_strided_slice %21 {offsets = [16, 16], sizes = [16, 8], strides = [1, 1]} : vector<32x32xbf16> to vector<16x8xbf16>
    "tpu.trace_start"() <{level = 10 : i32, message = "qd,kd->qk"}> : () -> ()
    %cst_50 = arith.constant dense<0.000000e+00> : vector<8x16xf32>
    %127 = tpu.matmul %124, %125, %cst_50 {dimension_numbers = #tpu.dot_dimension_numbers<[1], [1], [0], [0], [0, 0, 1, 0], [], []>} : vector<8x8xbf16>, vector<16x8xbf16>, vector<8x16xf32> -> vector<8x16xf32>
    "tpu.trace_stop"() : () -> ()
    %cst_51 = arith.constant dense<0xFF800000> : vector<8xf32>
    %128 = vector.multi_reduction <maximumf>, %127, %cst_51 [1] : vector<8x16xf32> to vector<8xf32>
    %129 = vector.shape_cast %128 : vector<8xf32> to vector<8x1xf32>
    %130 = vector.broadcast %129 : vector<8x1xf32> to vector<8x16xf32>
    %131 = arith.subf %127, %130 : vector<8x16xf32>
    %132 = math.exp %131 : vector<8x16xf32>
    %cst_52 = arith.constant dense<0.000000e+00> : vector<8xf32>
    %133 = vector.multi_reduction <add>, %132, %cst_52 [1] : vector<8x16xf32> to vector<8xf32>
    %134 = vector.shape_cast %133 : vector<8xf32> to vector<8x1xf32>
    %135 = arith.truncf %132 : vector<8x16xf32> to vector<8x16xbf16>
    "tpu.trace_start"() <{level = 10 : i32, message = "qk,kd->qd"}> : () -> ()
    %cst_53 = arith.constant dense<0.000000e+00> : vector<8x8xf32>
    %136 = tpu.matmul %135, %126, %cst_53 {dimension_numbers = #tpu.dot_dimension_numbers<[1], [0], [0], [1], [0, 0, 1, 1], [], []>} : vector<8x16xbf16>, vector<16x8xbf16>, vector<8x8xf32> -> vector<8x8xf32>
    "tpu.trace_stop"() : () -> ()
    %137 = tpu.reciprocal %134 {approx = true} : vector<8x1xf32> -> vector<8x1xf32>
    %138 = vector.broadcast %137 : vector<8x1xf32> to vector<8x8xf32>
    %139 = arith.mulf %136, %138 : vector<8x8xf32>
    %c8_54 = arith.constant 8 : index
    %c16_55 = arith.constant 16 : index
    %140 = vector.load %arg12[%c8_54, %c16_55] : memref<16x32xf32, #tpu.memory_space<vmem>>, vector<8x8xf32>
    tpu.vector_store %arg12[%c8_54, %c16_55], %139 {strides = array<i32>} : memref<16x32xf32, #tpu.memory_space<vmem>>, vector<8x8xf32>,
    %141 = vector.extract_strided_slice %19 {offsets = [8, 24], sizes = [8, 8], strides = [1, 1]} : vector<16x32xbf16> to vector<8x8xbf16>
    %142 = vector.extract_strided_slice %20 {offsets = [16, 24], sizes = [16, 8], strides = [1, 1]} : vector<32x32xbf16> to vector<16x8xbf16>
    %143 = vector.extract_strided_slice %21 {offsets = [16, 24], sizes = [16, 8], strides = [1, 1]} : vector<32x32xbf16> to vector<16x8xbf16>
    "tpu.trace_start"() <{level = 10 : i32, message = "qd,kd->qk"}> : () -> ()
    %cst_56 = arith.constant dense<0.000000e+00> : vector<8x16xf32>
    %144 = tpu.matmul %141, %142, %cst_56 {dimension_numbers = #tpu.dot_dimension_numbers<[1], [1], [0], [0], [0, 0, 1, 0], [], []>} : vector<8x8xbf16>, vector<16x8xbf16>, vector<8x16xf32> -> vector<8x16xf32>
    "tpu.trace_stop"() : () -> ()
    %cst_57 = arith.constant dense<0xFF800000> : vector<8xf32>
    %145 = vector.multi_reduction <maximumf>, %144, %cst_57 [1] : vector<8x16xf32> to vector<8xf32>
    %146 = vector.shape_cast %145 : vector<8xf32> to vector<8x1xf32>
    %147 = vector.broadcast %146 : vector<8x1xf32> to vector<8x16xf32>
    %148 = arith.subf %144, %147 : vector<8x16xf32>
    %149 = math.exp %148 : vector<8x16xf32>
    %cst_58 = arith.constant dense<0.000000e+00> : vector<8xf32>
    %150 = vector.multi_reduction <add>, %149, %cst_58 [1] : vector<8x16xf32> to vector<8xf32>
    %151 = vector.shape_cast %150 : vector<8xf32> to vector<8x1xf32>
    %152 = arith.truncf %149 : vector<8x16xf32> to vector<8x16xbf16>
    "tpu.trace_start"() <{level = 10 : i32, message = "qk,kd->qd"}> : () -> ()
    %cst_59 = arith.constant dense<0.000000e+00> : vector<8x8xf32>
    %153 = tpu.matmul %152, %143, %cst_59 {dimension_numbers = #tpu.dot_dimension_numbers<[1], [0], [0], [1], [0, 0, 1, 1], [], []>} : vector<8x16xbf16>, vector<16x8xbf16>, vector<8x8xf32> -> vector<8x8xf32>
    "tpu.trace_stop"() : () -> ()
    %154 = tpu.reciprocal %151 {approx = true} : vector<8x1xf32> -> vector<8x1xf32>
    %155 = vector.broadcast %154 : vector<8x1xf32> to vector<8x8xf32>
    %156 = arith.mulf %153, %155 : vector<8x8xf32>
    %c8_60 = arith.constant 8 : index
    %c24_61 = arith.constant 24 : index
    %157 = vector.load %arg12[%c8_60, %c24_61] : memref<16x32xf32, #tpu.memory_space<vmem>>, vector<8x8xf32>
    tpu.vector_store %arg12[%c8_60, %c24_61], %156 {strides = array<i32>} : memref<16x32xf32, #tpu.memory_space<vmem>>, vector<8x8xf32>,
    %c0_62 = arith.constant 0 : index
    %c0_63 = arith.constant 0 : index
    %158 = vector.load %arg12[%c0_62, %c0_63] : memref<16x32xf32, #tpu.memory_space<vmem>>, vector<16x32xf32>
    %159 = arith.truncf %158 : vector<16x32xf32> to vector<16x32xbf16>
    %c0_64 = arith.constant 0 : index
    %c0_65 = arith.constant 0 : index
    %160 = vector.load %arg6[%c0_64, %c0_65] : memref<32x32xbf16, #tpu.memory_space<vmem>>, vector<32x32xbf16>
    %cst_66 = arith.constant dense<0.000000e+00> : vector<16x32xf32>
    %161 = tpu.matmul %159, %160, %cst_66 {dimension_numbers = #tpu.dot_dimension_numbers<[1], [0], [0], [1], [0, 0, 1, 1], [], []>} : vector<16x32xbf16>, vector<32x32xbf16>, vector<16x32xf32> -> vector<16x32xf32>
    %c0_67 = arith.constant 0 : index
    %c0_68 = arith.constant 0 : index
    %162 = vector.load %arg10[%c0_67, %c0_68] : memref<1x32xf32, #tpu.memory_space<vmem>>, vector<1x32xf32>
    %163 = vector.broadcast %162 : vector<1x32xf32> to vector<16x32xf32>
    %164 = arith.addf %161, %163 : vector<16x32xf32>
    %c0_69 = arith.constant 0 : index
    %c0_70 = arith.constant 0 : index
    %165 = vector.load %arg11[%c0_69, %c0_70] : memref<16x32xf32, #tpu.memory_space<vmem>>, vector<16x32xf32>
    tpu.vector_store %arg11[%c0_69, %c0_70], %164 {strides = array<i32>} : memref<16x32xf32, #tpu.memory_space<vmem>>, vector<16x32xf32>,
    return
  }
  func.func @transform_0(%arg0: i32) -> (i32, i32) {
    %c0_i32 = arith.constant 0 : i32
    %c0_i32_0 = arith.constant 0 : i32
    return %arg0, %c0_i32 : i32, i32
  }
  func.func @transform_1(%arg0: i32) -> (i32, i32) {
    %c0_i32 = arith.constant 0 : i32
    %c0_i32_0 = arith.constant 0 : i32
    return %arg0, %c0_i32 : i32, i32
  }
  func.func @transform_2(%arg0: i32) -> (i32, i32) {
    %c0_i32 = arith.constant 0 : i32
    %c0_i32_0 = arith.constant 0 : i32
    %c0_i32_1 = arith.constant 0 : i32
    return %c0_i32, %c0_i32_0 : i32, i32
  }
  func.func @transform_3(%arg0: i32) -> (i32, i32) {
    %c0_i32 = arith.constant 0 : i32
    %c0_i32_0 = arith.constant 0 : i32
    %c0_i32_1 = arith.constant 0 : i32
    return %c0_i32, %c0_i32_0 : i32, i32
  }
  func.func @transform_4(%arg0: i32) -> (i32, i32) {
    %c0_i32 = arith.constant 0 : i32
    %c0_i32_0 = arith.constant 0 : i32
    %c0_i32_1 = arith.constant 0 : i32
    return %c0_i32, %c0_i32_0 : i32, i32
  }
  func.func @transform_5(%arg0: i32) -> (i32, i32) {
    %c0_i32 = arith.constant 0 : i32
    %c0_i32_0 = arith.constant 0 : i32
    %c0_i32_1 = arith.constant 0 : i32
    return %c0_i32, %c0_i32_0 : i32, i32
  }
  func.func @transform_6(%arg0: i32) -> (i32, i32) {
    %c0_i32 = arith.constant 0 : i32
    %c0_i32_0 = arith.constant 0 : i32
    %c0_i32_1 = arith.constant 0 : i32
    return %c0_i32, %c0_i32_0 : i32, i32
  }
  func.func @transform_7(%arg0: i32) -> (i32, i32) {
    %c0_i32 = arith.constant 0 : i32
    %c0_i32_0 = arith.constant 0 : i32
    %c0_i32_1 = arith.constant 0 : i32
    return %c0_i32, %c0_i32_0 : i32, i32
  }
  func.func @transform_8(%arg0: i32) -> (i32, i32) {
    %c0_i32 = arith.constant 0 : i32
    %c0_i32_0 = arith.constant 0 : i32
    %c0_i32_1 = arith.constant 0 : i32
    return %c0_i32, %c0_i32_0 : i32, i32
  }
  func.func @transform_9(%arg0: i32) -> (i32, i32) {
    %c0_i32 = arith.constant 0 : i32
    %c0_i32_0 = arith.constant 0 : i32
    %c0_i32_1 = arith.constant 0 : i32
    return %c0_i32, %c0_i32_0 : i32, i32
  }
  func.func @transform_10(%arg0: i32) -> (i32, i32) {
    %c0_i32 = arith.constant 0 : i32
    %c0_i32_0 = arith.constant 0 : i32
    return %arg0, %c0_i32 : i32, i32
  }
}

</mosaic_0001>

<bundles_post_ra>
// kernel: tpu_custom_call.1
= control target key start
LH: loop header
LB: loop body
LE: loop exit
PB: predicated region body
PF: predicated region fallthrough
CT: control target
= control target key end

     0   :  { %15 = vsyncpa [#allocation4], 0  ;;  %s2295_s0 = inlined_call_operand.hbm [shape: f32[16,32], index: 0, kind: input, shape index: {}]   ;;  %s2296_s1 = inlined_call_operand.hbm [shape: f32[32,32], index: 1, kind: input, shape index: {}]   ;;  %s2297_s2 = inlined_call_operand.hbm [shape: bf16[32,32], index: 2, kind: input, shape index: {}]   ;;  %s2298_s3 = inlined_call_operand.hbm [shape: bf16[32,32], index: 3, kind: input, shape index: {}]   ;;  %s2299_s4 = inlined_call_operand.hbm [shape: bf16[32,32], index: 4, kind: input, shape index: {}]   ;;  %s2300_s5 = inlined_call_operand.hbm [shape: bf16[32,32], index: 5, kind: input, shape index: {}]   ;;  %s2301_s6 = inlined_call_operand.hbm [shape: f32[1,32], index: 6, kind: input, shape index: {}]   ;;  %s2302_s7 = inlined_call_operand.hbm [shape: f32[1,32], index: 7, kind: input, shape index: {}]   ;;  %s2303_s8 = inlined_call_operand.hbm [shape: f32[1,32], index: 8, kind: input, shape index: {}]   ;;  %s2304_s9 = inlined_call_operand.hbm [shape: f32[1,32], index: 9, kind: input, shape index: {}]   ;;  %s2305_s10 = inlined_call_operand.hbm [shape: f32[16,32], index: 10, kind: output, shape index: {}]  }
   0x1   :  { %16 = vsyncpa [#allocation7], 0 }
   0x2   :  { %17 = vsyncpa [#allocation10], 0 }
   0x3   :  { %18 = vsyncpa [#allocation13], 0 }
   0x4   :  { %19 = vsyncpa [#allocation16], 0 }
   0x5   :  { %20 = vsyncpa [#allocation19], 0 }
   0x6   :  { %21 = vsyncpa [#allocation5], 0  ;;  %s1910_s13 = smov [#allocation6]   ;;  %s1654_s17 = scalar_lea.hbm %s2296_s1, 512 }
   0x7   :  { %s39_s14 = sshll.u32 %s1910_s13, 4  ;;  %p1655_p0 = scmp.ne.s32.totalorder %s2296_s1, %s1654_s17  ;;  %s40_s14 = int_to_ptr.vmem [resolvable:$true] %s39_s14 }
   0x8   :  { %p1658_p1 = scmp.lt.u32.totalorder %s1654_s17, %s2296_s1 }
   0xa   :  { %p1660_p2 = pnand %p1658_p1, %p1655_p0 }
   0xc   :  { %1663 = shalt.err (!%p1660_p2)
}
   0xd   :  { %s1664_s22 = scalar_lea.vmem %s40_s14, 512  ;;  %p1669_p4 = scmp.lt.s32.totalorder %s40_s14, %s40_s14 }
   0xe   :  { %p1665_p3 = scmp.ne.s32.totalorder %s40_s14, %s1664_s22  ;;  %p1670_p5 = scmp.lt.s32.totalorder %s1664_s22, %s1664_s22 }
  0x10   :  { %p1671_p6 = por %p1670_p5, %p1669_p4 }
  0x12   :  { %p1672_p7 = pnand %p1671_p6, %p1665_p3 }
  0x14   :  { %1675 = shalt.err (!%p1672_p7)
}
  0x15   :  { %s1911_s23 = smov 128   ;;  %s1912_s24 = smov 8  }
  0x16   :  { %45 = dma.hbm_to_vmem [thread:$0]  %s2296_s1, 512, %s40_s14, [#allocation7], %s1911_s23, %s1911_s23, %s1912_s24  }
  0x17   :  { %s1913_s27 = smov [#allocation9]   ;;  %s1914_s29 = smov [#allocation12]  }
  0x18   :  { %s63_s28 = sshll.u32 %s1913_s27, 4  ;;  %s87_s30 = sshll.u32 %s1914_s29, 4  ;;  %s64_s28 = int_to_ptr.vmem [resolvable:$true] %s63_s28  ;;  %s88_s30 = int_to_ptr.vmem [resolvable:$true] %s87_s30 }
  0x19   :  { %s1676_s13 = scalar_lea.hbm %s2298_s3, 256 }
  0x1a   :  { %p1677_p8 = scmp.ne.s32.totalorder %s2298_s3, %s1676_s13  ;;  %p1680_p9 = scmp.lt.u32.totalorder %s1676_s13, %s2298_s3 }
  0x1c   :  { %p1682_p10 = pnand %p1680_p9, %p1677_p8 }
  0x1e   :  { %1685 = shalt.err (!%p1682_p10)
}
  0x1f   :  { %s1686_s1 = scalar_lea.vmem %s64_s28, 256  ;;  %p1691_p12 = scmp.lt.s32.totalorder %s64_s28, %s64_s28 }
  0x20   :  { %p1687_p11 = scmp.ne.s32.totalorder %s64_s28, %s1686_s1  ;;  %p1692_p13 = scmp.lt.s32.totalorder %s1686_s1, %s1686_s1 }
  0x22   :  { %p1693_p0 = por %p1692_p13, %p1691_p12 }
  0x24   :  { %p1694_p1 = pnand %p1693_p0, %p1687_p11 }
  0x26   :  { %1697 = shalt.err (!%p1694_p1)
}
  0x27   :  { %s1915_s14 = smov 64   ;;  %s1916_s19 = smov 4  }
  0x28   :  { %69 = dma.hbm_to_vmem [thread:$0]  %s2298_s3, 256, %s64_s28, [#allocation10], %s1915_s14, %s1915_s14, %s1916_s19  }
  0x29   :  { %s1698_s26 = scalar_lea.hbm %s2300_s5, 256 }
  0x2a   :  { %p1699_p2 = scmp.ne.s32.totalorder %s2300_s5, %s1698_s26  ;;  %p1702_p3 = scmp.lt.u32.totalorder %s1698_s26, %s2300_s5 }
  0x2c   :  { %p1704_p4 = pnand %p1702_p3, %p1699_p2 }
  0x2e   :  { %1707 = shalt.err (!%p1704_p4)
}
  0x2f   :  { %s1708_s13 = scalar_lea.vmem %s88_s30, 256  ;;  %p1713_p6 = scmp.lt.s32.totalorder %s88_s30, %s88_s30 }
  0x30   :  { %p1709_p5 = scmp.ne.s32.totalorder %s88_s30, %s1708_s13  ;;  %p1714_p7 = scmp.lt.s32.totalorder %s1708_s13, %s1708_s13 }
  0x32   :  { %p1715_p8 = por %p1714_p7, %p1713_p6 }
  0x34   :  { %p1716_p9 = pnand %p1715_p8, %p1709_p5 }
  0x36   :  { %1719 = shalt.err (!%p1716_p9)
}
  0x37   :  { %93 = dma.hbm_to_vmem [thread:$0]  %s2300_s5, 256, %s88_s30, [#allocation13], %s1915_s14, %s1915_s14, %s1916_s19  }
  0x38   :  { %s1917_s15 = smov [#allocation15]   ;;  %s1918_s17 = smov [#allocation3]  }
  0x39   :  { %s110_s16 = sshll.u32 %s1917_s15, 4  ;;  %s27_s18 = sshll.u32 %s1918_s17, 4  ;;  %s111_s16 = int_to_ptr.vmem [resolvable:$true] %s110_s16  ;;  %s28_s18 = int_to_ptr.vmem [resolvable:$true] %s27_s18 }
  0x3a   :  { %s1720_s21 = scalar_lea.hbm %s2302_s7, 16 }
  0x3b   :  { %p1721_p10 = scmp.ne.s32.totalorder %s2302_s7, %s1720_s21  ;;  %p1724_p11 = scmp.lt.u32.totalorder %s1720_s21, %s2302_s7 }
  0x3d   :  { %p1726_p12 = pnand %p1724_p11, %p1721_p10 }
  0x3f   :  { %1729 = shalt.err (!%p1726_p12)
}
  0x40   :  { %s1730_s5 = scalar_lea.vmem %s111_s16, 16  ;;  %s1734_s30 = scalar_lea.vmem %s111_s16, 32 }
  0x41   :  { %p1731_p13 = scmp.ne.s32.totalorder %s111_s16, %s1730_s5  ;;  %p1735_p0 = scmp.lt.s32.totalorder %s111_s16, %s111_s16 }
  0x42   :  { %p1736_p1 = scmp.lt.s32.totalorder %s1734_s30, %s1730_s5 }
  0x44   :  { %p1737_p2 = por %p1736_p1, %p1735_p0 }
  0x46   :  { %p1738_p3 = pnand %p1737_p2, %p1731_p13 }
  0x48   :  { %1741 = shalt.err (!%p1738_p3)
}
  0x49   :  { %113 = dma.hbm_to_vmem [thread:$0]  %s2302_s7, 16, %s111_s16, [#allocation16]  }
  0x4a   :  { %s1742_s3 = scalar_lea.hbm %s2295_s0, 256 }
  0x4b   :  { %p1743_p4 = scmp.ne.s32.totalorder %s2295_s0, %s1742_s3  ;;  %p1746_p5 = scmp.lt.u32.totalorder %s1742_s3, %s2295_s0 }
  0x4d   :  { %p1748_p6 = pnand %p1746_p5, %p1743_p4 }
  0x4f   :  { %1751 = shalt.err (!%p1748_p6)
}
  0x50   :  { %s1752_s20 = scalar_lea.vmem %s28_s18, 256  ;;  %p1757_p8 = scmp.lt.s32.totalorder %s28_s18, %s28_s18 }
  0x51   :  { %p1753_p7 = scmp.ne.s32.totalorder %s28_s18, %s1752_s20  ;;  %p1758_p9 = scmp.lt.s32.totalorder %s1752_s20, %s1752_s20 }
  0x53   :  { %p1759_p10 = por %p1758_p9, %p1757_p8 }
  0x55   :  { %p1760_p11 = pnand %p1759_p10, %p1753_p7 }
  0x57   :  { %1763 = shalt.err (!%p1760_p11)
}
  0x58   :  { %33 = dma.hbm_to_vmem [thread:$0]  %s2295_s0, 256, %s28_s18, [#allocation4], %s1911_s23, %s1911_s23, %s1912_s24  }
  0x59   :  { %s1919_s21 = smov [#allocation8]   ;;  %s1920_s25 = smov [#allocation11]  }
  0x5a   :  { %s51_s22 = sshll.u32 %s1919_s21, 4  ;;  %s75_s26 = sshll.u32 %s1920_s25, 4  ;;  %s52_s22 = int_to_ptr.vmem [resolvable:$true] %s51_s22  ;;  %s76_s26 = int_to_ptr.vmem [resolvable:$true] %s75_s26 }
  0x5b   :  { %s1764_s30 = scalar_lea.hbm %s2297_s2, 256 }
  0x5c   :  { %p1765_p12 = scmp.ne.s32.totalorder %s2297_s2, %s1764_s30  ;;  %p1768_p13 = scmp.lt.u32.totalorder %s1764_s30, %s2297_s2 }
  0x5e   :  { %p1770_p0 = pnand %p1768_p13, %p1765_p12 }
  0x60   :  { %1773 = shalt.err (!%p1770_p0)
}
  0x61   :  { %s1774_s0 = scalar_lea.vmem %s52_s22, 256  ;;  %p1779_p2 = scmp.lt.s32.totalorder %s52_s22, %s52_s22 }
  0x62   :  { %p1775_p1 = scmp.ne.s32.totalorder %s52_s22, %s1774_s0  ;;  %p1780_p3 = scmp.lt.s32.totalorder %s1774_s0, %s1774_s0 }
  0x64   :  { %p1781_p4 = por %p1780_p3, %p1779_p2 }
  0x66   :  { %p1782_p5 = pnand %p1781_p4, %p1775_p1 }
  0x68   :  { %1785 = shalt.err (!%p1782_p5)
}
  0x69   :  { %57 = dma.hbm_to_vmem [thread:$0]  %s2297_s2, 256, %s52_s22, [#allocation7], %s1915_s14, %s1915_s14, %s1916_s19  }
  0x6a   :  { %s1786_s17 = scalar_lea.hbm %s2299_s4, 256 }
  0x6b   :  { %p1787_p6 = scmp.ne.s32.totalorder %s2299_s4, %s1786_s17  ;;  %p1790_p7 = scmp.lt.u32.totalorder %s1786_s17, %s2299_s4 }
  0x6d   :  { %p1792_p8 = pnand %p1790_p7, %p1787_p6 }
  0x6f   :  { %1795 = shalt.err (!%p1792_p8)
}
  0x70   :  { %s1796_s21 = scalar_lea.vmem %s76_s26, 256  ;;  %p1801_p10 = scmp.lt.s32.totalorder %s76_s26, %s76_s26 }
  0x71   :  { %p1797_p9 = scmp.ne.s32.totalorder %s76_s26, %s1796_s21  ;;  %p1802_p11 = scmp.lt.s32.totalorder %s1796_s21, %s1796_s21 }
  0x73   :  { %p1803_p12 = por %p1802_p11, %p1801_p10 }
  0x75   :  { %p1804_p13 = pnand %p1803_p12, %p1797_p9 }
  0x77   :  { %1807 = shalt.err (!%p1804_p13)
}
  0x78   :  { %81 = dma.hbm_to_vmem [thread:$0]  %s2299_s4, 256, %s76_s26, [#allocation10], %s1915_s14, %s1915_s14, %s1916_s19  }
  0x79   :  { %s1921_s25 = smov [#allocation14]   ;;  %s1922_s5 = smov [#allocation17]  }
  0x7a   :  { %s100_s27 = sshll.u32 %s1921_s25, 4  ;;  %s120_s30 = sshll.u32 %s1922_s5, 4  ;;  %s101_s27 = int_to_ptr.vmem [resolvable:$true] %s100_s27  ;;  %s121_s30 = int_to_ptr.vmem [resolvable:$true] %s120_s30 }
  0x7b   :  { %s1808_s12 = scalar_lea.hbm %s2301_s6, 16 }
  0x7c   :  { %p1809_p0 = scmp.ne.s32.totalorder %s2301_s6, %s1808_s12  ;;  %p1812_p1 = scmp.lt.u32.totalorder %s1808_s12, %s2301_s6 }
  0x7e   :  { %p1814_p2 = pnand %p1812_p1, %p1809_p0 }
  0x80   :  { %1817 = shalt.err (!%p1814_p2)
}
  0x81   :  { %s1818_s4 = scalar_lea.vmem %s101_s27, 16  ;;  %s1822_s14 = scalar_lea.vmem %s101_s27, 32 }
  0x82   :  { %p1819_p3 = scmp.ne.s32.totalorder %s101_s27, %s1818_s4  ;;  %p1823_p4 = scmp.lt.s32.totalorder %s101_s27, %s101_s27 }
  0x83   :  { %p1824_p5 = scmp.lt.s32.totalorder %s1822_s14, %s1818_s4 }
  0x85   :  { %p1825_p6 = por %p1824_p5, %p1823_p4 }
  0x87   :  { %p1826_p7 = pnand %p1825_p6, %p1819_p3 }
  0x89   :  { %1829 = shalt.err (!%p1826_p7)
}
  0x8a   :  { %103 = dma.hbm_to_vmem [thread:$0]  %s2301_s6, 16, %s101_s27, [#allocation13]  }
  0x8b   :  { %s1830_s17 = scalar_lea.hbm %s2303_s8, 16 }
  0x8c   :  { %p1831_p8 = scmp.ne.s32.totalorder %s2303_s8, %s1830_s17  ;;  %p1834_p9 = scmp.lt.u32.totalorder %s1830_s17, %s2303_s8 }
  0x8e   :  { %p1836_p10 = pnand %p1834_p9, %p1831_p8 }
  0x90   :  { %1839 = shalt.err (!%p1836_p10)
}
  0x91   :  { %s1840_s21 = scalar_lea.vmem %s121_s30, 16  ;;  %s1844_s2 = scalar_lea.vmem %s121_s30, 32 }
  0x92   :  { %p1841_p11 = scmp.ne.s32.totalorder %s121_s30, %s1840_s21  ;;  %p1845_p12 = scmp.lt.s32.totalorder %s121_s30, %s121_s30 }
  0x93   :  { %p1846_p13 = scmp.lt.s32.totalorder %s1844_s2, %s1840_s21 }
  0x95   :  { %p1847_p0 = por %p1846_p13, %p1845_p12 }
  0x97   :  { %p1848_p1 = pnand %p1847_p0, %p1841_p11 }
  0x99   :  { %1851 = shalt.err (!%p1848_p1)
}
  0x9a   :  { %123 = dma.hbm_to_vmem [thread:$0]  %s2303_s8, 16, %s121_s30, [#allocation16]  }
  0x9b   :  { %s1923_s25 = smov [#allocation18]   ;;  %s1852_s11 = scalar_lea.hbm %s2304_s9, 16 }
  0x9c   :  { %s130_s27 = sshll.u32 %s1923_s25, 4  ;;  %p1853_p2 = scmp.ne.s32.totalorder %s2304_s9, %s1852_s11  ;;  %s131_s27 = int_to_ptr.vmem [resolvable:$true] %s130_s27 }
  0x9d   :  { %p1856_p3 = scmp.lt.u32.totalorder %s1852_s11, %s2304_s9 }
  0x9f   :  { %p1858_p4 = pnand %p1856_p3, %p1853_p2 }
  0xa1   :  { %1861 = shalt.err (!%p1858_p4)
}
  0xa2   :  { %s1862_s3 = scalar_lea.vmem %s131_s27, 16  ;;  %s1866_s8 = scalar_lea.vmem %s131_s27, 32 }
  0xa3   :  { %p1863_p5 = scmp.ne.s32.totalorder %s131_s27, %s1862_s3  ;;  %p1867_p6 = scmp.lt.s32.totalorder %s131_s27, %s131_s27 }
  0xa4   :  { %p1868_p7 = scmp.lt.s32.totalorder %s1866_s8, %s1862_s3 }
  0xa6   :  { %p1869_p8 = por %p1868_p7, %p1867_p6 }
  0xa8   :  { %p1870_p9 = pnand %p1869_p8, %p1863_p5 }
  0xaa   :  { %1873 = shalt.err (!%p1870_p9)
}
  0xab   :  { %133 = dma.hbm_to_vmem [thread:$0]  %s2304_s9, 16, %s131_s27, [#allocation19]  }
  0xac   :  { %1896 = dma.done.wait [#allocation4], 256  }
  0xad   :  { %1897 = vsyncadd [#allocation4], 4294967040 }
  0xae   :  { %1898 = dma.done.wait [#allocation7], 768  }
  0xaf   :  { %1899 = vsyncadd [#allocation7], 4294966528 }
  0xb0   :  { %1900 = dma.done.wait [#allocation10], 512  }
  0xb1   :  { %1901 = vsyncadd [#allocation10], 4294966784 }
  0xb2   :  { %1902 = dma.done.wait [#allocation13], 272  }
  0xb3   :  { %1903 = vsyncadd [#allocation13], 4294967024 }
  0xb4   :  { %1904 = dma.done.wait [#allocation16], 32  }
  0xb5   :  { %1905 = vsyncadd [#allocation16], 4294967264 }
  0xb6   :  { %1906 = dma.done.wait [#allocation19], 16  }
  0xb7   :  { %1907 = vsyncadd [#allocation19], 4294967280  ;;  %v1924_v0 = vmov 0.0   ;;  %vm1925_vm0 = vmmov 0   ;;  %v1614_v1 = vld [vmem:[#allocation9] sm:$0xff]   ;;  %v1615_v2 = vld [vmem:[#allocation9 + $0x8] sm:$0xff]  }
  0xb8   :  { %1464 = vmatprep.subr.bf16.mxu0 %v1924_v0  ;;  %1468 = vmatprep.mubr.msk.bf16.mxu0 %vm1925_vm0, %v1924_v0  ;;  %v1616_v3 = vld [vmem:[#allocation8] sm:$0xff]   ;;  %v169_v5 = vld [vmem:[#allocation6 + $0x8] sm:$0xff]  ;;  %vm197_vm1 = vcmask 261120   ;;  %v170_v6 = vld [vmem:[#allocation6 + $0x10] sm:$0xff]  ;;  %vm397_vm2 = vcmask 64512   ;;  %s1926_s9 = smov 112  }
  0xb9   :  { %1472 = vmatprep.subr.bf16.mxu1 %v1614_v1  ;;  %v168_v4 = vld [vmem:[#allocation6] sm:$0xff]  ;;  %1465 = vmatpush3.bf16.msra.mxu0 %v1616_v3  ;;  %v171_v8 = vld [vmem:[#allocation6 + $0x18] sm:$0xff]  ;;  %v1617_v9 = vld [vmem:[#allocation8 + $0x8] sm:$0xff]   ;;  %s1927_s14 = smov 120   ;;  %s1928_s19 = smov 104   ;;  %vm444_vm3 = vcmask 130048  }
  0xba   :  { %1473 = vmatpush3.bf16.msra.mxu1 %v1614_v1  ;;  %v172_v7 = vpack.c.bf16 %v169_v5, %v168_v4  ;;  %1466 = vmatprep.subr.bf16.mxu0 %v1924_v0  ;;  %v165_v10 = vld [vmem:[#allocation3] sm:$0xff]  ;;  %v166_v11 = vld [vmem:[#allocation3 + $0x8] sm:$0xff]  ;;  %v173_v12 = vpack.c.bf16 %v171_v8, %v170_v6  ;;  %v1384_v14 = vld [vmem:[#allocation14] ss:$0 sm:$0xff]  ;;  %s1929_s26 = smov 16   ;;  %s1930_s28 = smov 24  }
  0xbb   :  { %1474 = vmatprep.subr.bf16.mxu1 %v1615_v2  ;;  %v167_v13 = vpack.c.bf16 %v166_v11, %v165_v10  ;;  %v1388_v16 = vld [vmem:[#allocation15] ss:$0 sm:$0xff]  ;;  %v1619_v34 = vld [vmem:[#allocation11 + $0x8] sm:$0xff]   ;;  %v1393_v56 = vld [vmem:[#allocation17] ss:$0 sm:$0xff]  ;;  %vm616_vm4 = vcmask 130112  }
  0xbc   :  { %1476 = vmatprep.mubr.msk.bf16.mxu1 %vm197_vm1, %v172_v7  ;;  %v1618_v22 = vld [vmem:[#allocation11] sm:$0xff]   ;;  %vm730_vm5 = vcmask 195712   ;;  %vm844_vm6 = vcmask 261312   ;;  %s1931_s15 = smov [#allocation20]  }
  0xbd   :  { %1467 = vmatpush3.bf16.msra.mxu0 %v1617_v9  ;;  %s1367_s17 = sshll.u32 %s1931_s15, 4  ;;  %s1368_s17 = int_to_ptr.vmem [resolvable:$true] %s1367_s17 }
  0xbe   :  { %1475 = vmatpush3.bf16.msra.mxu1 %v1615_v2  ;;  %1480 = vmatprep.subr.bf16.mxu0 %v1618_v22  ;;  %s1874_s1 = scalar_lea.vmem %s1368_s17, 256  ;;  %p1879_p11 = scmp.lt.s32.totalorder %s1368_s17, %s1368_s17 }
  0xbf   :  { %1488 = vmatprep.subr.bf16.mxu1 %v1924_v0  ;;  %p1875_p10 = scmp.ne.s32.totalorder %s1368_s17, %s1874_s1  ;;  %p1880_p12 = scmp.lt.s32.totalorder %s1874_s1, %s1874_s1 }
  0xc0   :  { %1469 = vmatmul.mubr.msk.bf16.vlgmr.msra.gmra.mrb[0].mxu0 %vm197_vm1, %v167_v13 }
  0xc1   :  { %1477 = vmatmul.mubr.msk.bf16.vlgmr.msra.gmra.mrb[0].mxu1 %vm197_vm1, %v173_v12  ;;  %1484 = vmatprep.mubr.msk.bf16.mxu0 %vm197_vm1, %v172_v7  ;;  %p1881_p13 = por %p1880_p12, %p1879_p11 }
  0xc2   :  { %1490 = vmatprep.mubr.msk.bf16.mxu1 %vm1925_vm0, %v1924_v0  ;;  %1481 = vmatpush3.bf16.msra.mxu0 %v1618_v22 }
  0xc3   :  { %1482 = vmatprep.subr.bf16.mxu0 %v1619_v34  ;;  %p1882_p0 = pnand %p1881_p13, %p1875_p10 }
  0xc6   :  { %1483 = vmatpush3.bf16.msra.mxu0 %v1619_v34 }
  0xc7   :  { %1494 = vmatprep.subr.bf16.mxu0 %v1924_v0 }
  0xc9   :  { %1485 = vmatmul.mubr.msk.bf16.vlgmr.msra.gmra.mrb[4].mxu0 %vm197_vm1, %v173_v12 }
  0xca   :  { %1496 = vmatprep.mubr.msk.bf16.mxu0 %vm1925_vm0, %v1924_v0 }
 0x193   :  { %v235_v18 = vpop.f32.mrb[0].mxu0 }
 0x194   :  { %v1478_v15 = vpop.f32.mrb[0].mxu1  ;;  %v236_v20 = vadd.f32 %v1384_v14, %v235_v18  ;;  %v1470_v21 = vpop.f32.mrb[1].mxu0 }
 0x195   :  { %v305_v17 = vpop.f32.mrb[1].mxu1  ;;  %v314_v23 = vadd.f32 %v1478_v15, %v1388_v16  ;;  %v238_v26 = vpop.f32.mrb[2].mxu0 }
 0x196   :  { %v1479_v19 = vpop.f32.mrb[2].mxu1  ;;  %v306_v27 = vadd.f32 %v1388_v16, %v305_v17  ;;  %v239_v29 = vadd.f32 %v1384_v14, %v238_v26  ;;  %v1471_v30 = vpop.f32.mrb[3].mxu0 }
 0x197   :  { %v317_v24 = vadd.f32 %v1479_v19, %v1388_v16  ;;  %v308_v25 = vpop.f32.mrb[3].mxu1 }
 0x198   :  { %v309_v28 = vadd.f32 %v1388_v16, %v308_v25  ;;  %v392_v33 = vpack.c.bf16 %v239_v29, %v236_v20 }
 0x199   :  { %v394_v31 = vpack.c.bf16 %v317_v24, %v314_v23 }
 0x19a   :  { %v393_v32 = vpack.c.bf16 %v309_v28, %v306_v27  ;;  %v846_v36 = vrot.slane %v392_v33, 4 }
 0x19b   :  { %v851_v46 = vsel %vm397_vm2, %v394_v31, 0 }
 0x19c   :  { %620 = vrot.lane.b32.xlu1 %v393_v32, %s1926_s9  ;;  %505 = vrot.lane.b32.xlu0 %v393_v32, %s1927_s14  ;;  %v402_v35 = vsel %vm397_vm2, %v393_v32, 0  ;;  %v1486_v57 = vpop.f32.mrb[4].mxu0 }
 0x19d   :  { %1489 = vmatpush3.bf16.xpose.msra.mxu1 %v402_v35  ;;  %v386_v58 = vadd.f32 %v1486_v57, %v1393_v56  ;;  %v377_v59 = vpop.f32.mrb[5].mxu0 }
 0x19e   :  { %1500 = vmatprep.subr.bf16.mxu1 %v1924_v0  ;;  %v378_v60 = vadd.f32 %v1393_v56, %v377_v59  ;;  %v1487_v61 = vpop.f32.mrb[6].mxu0 }
 0x19f   :  { %v389_v62 = vadd.f32 %v1487_v61, %v1393_v56  ;;  %v380_v63 = vpop.f32.mrb[7].mxu0 }
 0x1a0   :  { %618 = vrot.lane.b32.xlu1 %v392_v33, %s1926_s9  ;;  %502 = vrot.lane.b32.xlu0 %v392_v33, %s1927_s14  ;;  %v381_v2 = vadd.f32 %v1393_v56, %v380_v63 }
 0x1a1   :  { %v2193_v5 = vpack.c.bf16 %v389_v62, %v386_v58 }
 0x1a2   :  { %v395_v7 = vpack.c.bf16 %v381_v2, %v378_v60 }
 0x1a4   :  { %732 = vrot.lane.b32.xlu1 %v392_v33, %s1928_s19  ;;  %734 = vrot.lane.b32.xlu0 %v393_v32, %s1928_s19 }
 0x1a5   :  { %1491 = vmatmul.mubr.msk.bf16.vlgmr.msra.gmra.mrb[4].mxu1 %vm397_vm2, %v392_v33  ;;  %1495 = vmatpush3.bf16.msra.mxu0 %v395_v7 }
 0x1a6   :  { %1502 = vmatprep.mubr.msk.bf16.mxu1 %vm1925_vm0, %v1924_v0  ;;  %1506 = vmatprep.subr.bf16.mxu0 %v1924_v0 }
 0x1a8   :  { %952 = vrot.lane.b32.xlu0 %v394_v31, %s1927_s14  ;;  %949 = vrot.lane.b32.xlu1 %v846_v36, %s1927_s14 }
 0x1ac   :  { %1066 = vrot.lane.b32.xlu0 %v394_v31, %s1926_s9  ;;  %1064 = vrot.lane.b32.xlu1 %v846_v36, %s1926_s9 }
 0x1b0   :  { %1179 = vrot.lane.b32.xlu0 %v394_v31, %s1928_s19  ;;  %1177 = vrot.lane.b32.xlu1 %v846_v36, %s1928_s19 }
 0x20e   :  { %v506_v37 = vpop.permute.xlu0 %505  ;;  %v621_v39 = vpop.permute.xlu1 %620 }
 0x20f   :  { %v511_v38 = vsel %vm397_vm2, %v506_v37, 0  ;;  %v626_v41 = vsel %vm397_vm2, %v621_v39, 0 }
 0x210   :  { %1501 = vmatpush3.bf16.xpose.msra.mxu1 %v511_v38 }
 0x211   :  { %1512 = vmatprep.subr.bf16.mxu1 %v1924_v0 }
 0x212   :  { %v503_v40 = vpop.permute.xlu0 %502  ;;  %v619_v43 = vpop.permute.xlu1 %618 }
 0x216   :  { %v735_v42 = vpop.permute.xlu0 %734  ;;  %v733_v45 = vpop.permute.xlu1 %732 }
 0x217   :  { %1503 = vmatmul.mubr.msk.bf16.vlgmr.msra.gmra.mrb[8].mxu1 %vm397_vm2, %v503_v40  ;;  %v740_v44 = vsel %vm397_vm2, %v735_v42, 0 }
 0x218   :  { %1513 = vmatpush3.bf16.xpose.msra.mxu1 %v626_v41  ;;  %1514 = vmatprep.mubr.msk.bf16.mxu1 %vm1925_vm0, %v1924_v0 }
 0x219   :  { %1524 = vmatprep.subr.bf16.mxu1 %v1924_v0 }
 0x21a   :  { %v953_v47 = vpop.permute.xlu0 %952  ;;  %v950_v50 = vpop.permute.xlu1 %949 }
 0x21b   :  { %v958_v48 = vsel %vm397_vm2, %v953_v47, 0 }
 0x21e   :  { %v1067_v49 = vpop.permute.xlu0 %1066  ;;  %v1065_v53 = vpop.permute.xlu1 %1064 }
 0x21f   :  { %1515 = vmatmul.mubr.msk.bf16.vlgmr.msra.gmra.mrb[12].mxu1 %vm397_vm2, %v619_v43  ;;  %v1072_v51 = vsel %vm397_vm2, %v1067_v49, 0 }
 0x220   :  { %1525 = vmatpush3.bf16.xpose.msra.mxu1 %v740_v44  ;;  %1526 = vmatprep.mubr.msk.bf16.mxu1 %vm1925_vm0, %v1924_v0 }
 0x221   :  { %1536 = vmatprep.subr.bf16.mxu1 %v1924_v0 }
 0x222   :  { %v1180_v52 = vpop.permute.xlu0 %1179  ;;  %v1178_v55 = vpop.permute.xlu1 %1177 }
 0x223   :  { %v1185_v54 = vsel %vm397_vm2, %v1180_v52, 0 }
 0x227   :  { %1527 = vmatmul.mubr.msk.bf16.vlgmr.msra.gmra.mrb[16].mxu1 %vm397_vm2, %v733_v45 }
 0x228   :  { %1537 = vmatpush3.bf16.xpose.msra.mxu1 %v851_v46  ;;  %1538 = vmatprep.mubr.msk.bf16.mxu1 %vm1925_vm0, %v1924_v0 }
 0x229   :  { %1548 = vmatprep.subr.bf16.mxu1 %v1924_v0 }
 0x22f   :  { %1539 = vmatmul.mubr.msk.bf16.vlgmr.msra.gmra.mrb[20].mxu1 %vm397_vm2, %v846_v36 }
 0x230   :  { %1549 = vmatpush3.bf16.xpose.msra.mxu1 %v958_v48  ;;  %1550 = vmatprep.mubr.msk.bf16.mxu1 %vm1925_vm0, %v1924_v0 }
 0x231   :  { %1560 = vmatprep.subr.bf16.mxu1 %v1924_v0 }
 0x237   :  { %1551 = vmatmul.mubr.msk.bf16.vlgmr.msra.gmra.mrb[24].mxu1 %vm397_vm2, %v950_v50 }
 0x238   :  { %1561 = vmatpush3.bf16.xpose.msra.mxu1 %v1072_v51  ;;  %1562 = vmatprep.mubr.msk.bf16.mxu1 %vm1925_vm0, %v1924_v0 }
 0x239   :  { %1572 = vmatprep.subr.bf16.mxu1 %v1924_v0 }
 0x23f   :  { %1563 = vmatmul.mubr.msk.bf16.vlgmr.msra.gmra.mrb[28].mxu1 %vm397_vm2, %v1065_v53 }
 0x240   :  { %1573 = vmatpush3.bf16.xpose.msra.mxu1 %v1185_v54  ;;  %1574 = vmatprep.mubr.msk.bf16.mxu1 %vm1925_vm0, %v1924_v0 }
 0x241   :  { %1584 = vmatprep.subr.bf16.mxu1 %v1924_v0 }
 0x247   :  { %1575 = vmatmul.mubr.msk.bf16.vlgmr.msra.gmra.mrb[32].mxu1 %vm397_vm2, %v1178_v55 }
 0x248   :  { %1588 = vmatprep.mubr.msk.bf16.mxu1 %vm1925_vm0, %v1924_v0 }
 0x278   :  { %v438_v1 = vpop.f32.mrb[4].mxu1 }
 0x279   :  { %v1492_v3 = vpop.f32.mrb[5].mxu1  ;;  %v445_v4 = vsel %vm444_vm3, %v438_v1, -inf }
 0x27a   :  { %446 = vmax.xlane.f32.xlu0 %v445_v4  ;;  %v441_v6 = vpop.f32.mrb[6].mxu1 }
 0x27b   :  { %v1493_v8 = vpop.f32.mrb[7].mxu1 }
 0x2ea   :  { %v547_v9 = vpop.f32.mrb[8].mxu1 }
 0x2eb   :  { %v1504_v10 = vpop.f32.mrb[9].mxu1  ;;  %v553_v11 = vsel %vm444_vm3, %v547_v9, -inf }
 0x2ec   :  { %554 = vmax.xlane.f32.xlu1 %v553_v11  ;;  %v550_v12 = vpop.f32.mrb[10].mxu1 }
 0x2ed   :  { %v1505_v13 = vpop.f32.mrb[11].mxu1 }
 0x2f2   :  { %v662_v14 = vpop.f32.mrb[12].mxu1 }
 0x2f3   :  { %v1516_v15 = vpop.f32.mrb[13].mxu1  ;;  %v668_v16 = vsel %vm444_vm3, %v662_v14, -inf }
 0x2f4   :  { %669 = vmax.xlane.f32.xlu0 %v668_v16  ;;  %v665_v17 = vpop.f32.mrb[14].mxu1 }
 0x2f5   :  { %v1517_v18 = vpop.f32.mrb[15].mxu1 }
 0x2fa   :  { %v776_v19 = vpop.f32.mrb[16].mxu1 }
 0x2fb   :  { %v1528_v20 = vpop.f32.mrb[17].mxu1  ;;  %v782_v21 = vsel %vm444_vm3, %v776_v19, -inf }
 0x2fc   :  { %783 = vmax.xlane.f32.xlu0 %v782_v21  ;;  %v779_v22 = vpop.f32.mrb[18].mxu1 }
 0x2fd   :  { %v1529_v23 = vpop.f32.mrb[19].mxu1  ;;  %678 = vrot.lane.b32.xlu1 %v395_v7, %s1926_s9 }
 0x301   :  { %792 = vrot.lane.b32.xlu1 %v395_v7, %s1928_s19 }
 0x302   :  { %v2201_v24 = vpop.f32.mrb[20].mxu1 }
 0x303   :  { %v1540_v25 = vpop.f32.mrb[21].mxu1  ;;  %v893_v45 = vsel %vm444_vm3, %v2201_v24, -inf }
 0x304   :  { %v890_v26 = vpop.f32.mrb[22].mxu1 }
 0x305   :  { %v1541_v27 = vpop.f32.mrb[23].mxu1 }
 0x307   :  { %v447_v28 = vpop.xlane.xlu0 %446 }
 0x308   :  { %v448_v29 = vsub.f32 %v438_v1, %v447_v28 }
 0x30a   :  { %v449_v30 = vmul.f32 1.442695, %v448_v29  ;;  %v2203_v31 = vpop.f32.mrb[24].mxu1 }
 0x30b   :  { %v1552_v32 = vpop.f32.mrb[25].mxu1  ;;  %v1000_v46 = vsel %vm444_vm3, %v2203_v31, -inf }
 0x30c   :  { %1622 = vpow2.f32 %v449_v30  ;;  %v997_v33 = vpop.f32.mrb[26].mxu1 }
 0x30d   :  { %v1553_v34 = vpop.f32.mrb[27].mxu1 }
 0x312   :  { %v2205_v35 = vpop.f32.mrb[28].mxu1  ;;  %564 = vrot.lane.b32.xlu0 %v395_v7, %s1927_s14 }
 0x313   :  { %v1564_v36 = vpop.f32.mrb[29].mxu1  ;;  %v1114_v48 = vsel %vm444_vm3, %v2205_v35, -inf }
 0x314   :  { %v1111_v37 = vpop.f32.mrb[30].mxu1 }
 0x315   :  { %v1565_v38 = vpop.f32.mrb[31].mxu1 }
 0x316   :  { %v2208_v39 = vpop.eup %1622 }
 0x317   :  { %v454_v40 = vpack.c.bf16 %v2208_v39, %v2208_v39  ;;  %v451_v27 = vsel %vm444_vm3, %v2208_v39, 0.0 }
 0x319   :  { %1497 = vmatmul.mubr.msk.bf16.vlgmr.msra.gmra.mrb[8].mxu0 %vm444_vm3, %v454_v40 }
 0x31a   :  { %v2213_v41 = vpop.f32.mrb[32].mxu1  ;;  %1508 = vmatprep.mubr.msk.bf16.mxu0 %vm1925_vm0, %v1924_v0 }
 0x31b   :  { %v1576_v42 = vpop.f32.mrb[33].mxu1  ;;  %v1227_v47 = vsel %vm444_vm3, %v2213_v41, -inf }
 0x31c   :  { %v1224_v43 = vpop.f32.mrb[34].mxu1 }
 0x31d   :  { %v1577_v44 = vpop.f32.mrb[35].mxu1 }
 0x325   :  { %894 = vmax.xlane.f32.xlu1 %v893_v45 }
 0x329   :  { %1001 = vmax.xlane.f32.xlu1 %v1000_v46 }
 0x32d   :  { %1228 = vmax.xlane.f32.xlu1 %v1227_v47 }
 0x331   :  { %1115 = vmax.xlane.f32.xlu0 %v1114_v48 }
 0x33e   :  { %1124 = vrot.lane.b32.xlu1 %v2193_v5, %s1926_s9 }
 0x347   :  { %1011 = vrot.lane.b32.xlu0 %v2193_v5, %s1927_s14 }
 0x34b   :  { %1237 = vrot.lane.b32.xlu0 %v2193_v5, %s1928_s19 }
 0x379   :  { %v555_v49 = vpop.xlane.xlu1 %554 }
 0x37a   :  { %v556_v50 = vsub.f32 %v547_v9, %v555_v49 }
 0x37c   :  { %v557_v51 = vmul.f32 1.442695, %v556_v50 }
 0x37d   :  { %v679_v63 = vpop.permute.xlu1 %678 }
 0x37e   :  { %1624 = vpow2.f32 %v557_v51 }
 0x381   :  { %v670_v52 = vpop.xlane.xlu0 %669  ;;  %v793_v3 = vpop.permute.xlu1 %792 }
 0x382   :  { %v671_v53 = vsub.f32 %v662_v14, %v670_v52 }
 0x384   :  { %v672_v54 = vmul.f32 1.442695, %v671_v53 }
 0x386   :  { %1626 = vpow2.f32 %v672_v54 }
 0x388   :  { %v1625_v55 = vpop.eup %1624 }
 0x389   :  { %v784_v56 = vpop.xlane.xlu0 %783  ;;  %v559_v57 = vsel %vm444_vm3, %v1625_v55, 0.0  ;;  %v562_v61 = vpack.c.bf16 %v1625_v55, %v1625_v55 }
 0x38a   :  { %v785_v58 = vsub.f32 %v776_v19, %v784_v56  ;;  %560 = vadd.xlane.f32.xlu0 %v559_v57 }
 0x38c   :  { %v786_v60 = vmul.f32 1.442695, %v785_v58 }
 0x38d   :  { %v565_v59 = vpop.permute.xlu0 %564 }
 0x38e   :  { %1507 = vmatpush3.bf16.msra.mxu0 %v565_v59  ;;  %1628 = vpow2.f32 %v786_v60 }
 0x38f   :  { %1518 = vmatprep.subr.bf16.mxu0 %v1924_v0 }
 0x390   :  { %v1627_v62 = vpop.eup %1626 }
 0x391   :  { %1509 = vmatmul.mubr.msk.bf16.vlgmr.msra.gmra.mrb[12].mxu0 %vm444_vm3, %v562_v61  ;;  %v674_v1 = vsel %vm444_vm3, %v1627_v62, 0.0  ;;  %v677_v2 = vpack.c.bf16 %v1627_v62, %v1627_v62 }
 0x392   :  { %675 = vadd.xlane.f32.xlu0 %v674_v1  ;;  %1519 = vmatpush3.bf16.msra.mxu0 %v679_v63 }
 0x393   :  { %1520 = vmatprep.mubr.msk.bf16.mxu0 %vm1925_vm0, %v1924_v0  ;;  %1530 = vmatprep.subr.bf16.mxu0 %v1924_v0 }
 0x398   :  { %v1629_v4 = vpop.eup %1628 }
 0x399   :  { %1521 = vmatmul.mubr.msk.bf16.vlgmr.msra.gmra.mrb[16].mxu0 %vm444_vm3, %v677_v2  ;;  %v791_v6 = vpack.c.bf16 %v1629_v4, %v1629_v4  ;;  %v788_v23 = vsel %vm444_vm3, %v1629_v4, 0.0 }
 0x39a   :  { %1531 = vmatpush3.bf16.msra.mxu0 %v793_v3  ;;  %1532 = vmatprep.mubr.msk.bf16.mxu0 %vm1925_vm0, %v1924_v0 }
 0x39b   :  { %1542 = vmatprep.subr.bf16.mxu0 %v1924_v0 }
 0x3a1   :  { %1533 = vmatmul.mubr.msk.bf16.vlgmr.msra.gmra.mrb[20].mxu0 %vm444_vm3, %v791_v6 }
 0x3a2   :  { %1543 = vmatpush3.bf16.msra.mxu0 %v2193_v5  ;;  %1544 = vmatprep.mubr.msk.bf16.mxu0 %vm1925_vm0, %v1924_v0 }
 0x3a3   :  { %1554 = vmatprep.subr.bf16.mxu0 %v1924_v0 }
 0x3b2   :  { %v895_v7 = vpop.xlane.xlu1 %894 }
 0x3b3   :  { %v896_v8 = vsub.f32 %v2201_v24, %v895_v7 }
 0x3b5   :  { %v897_v9 = vmul.f32 1.442695, %v896_v8 }
 0x3b6   :  { %v1002_v10 = vpop.xlane.xlu1 %1001 }
 0x3b7   :  { %1630 = vpow2.f32 %v897_v9  ;;  %v1003_v11 = vsub.f32 %v2203_v31, %v1002_v10 }
 0x3b9   :  { %v1004_v12 = vmul.f32 1.442695, %v1003_v11 }
 0x3ba   :  { %v1229_v13 = vpop.xlane.xlu1 %1228 }
 0x3bb   :  { %1632 = vpow2.f32 %v1004_v12  ;;  %v1230_v14 = vsub.f32 %v2213_v41, %v1229_v13 }
 0x3bd   :  { %v1231_v17 = vmul.f32 1.442695, %v1230_v14 }
 0x3be   :  { %v1116_v15 = vpop.xlane.xlu0 %1115  ;;  %v1125_v25 = vpop.permute.xlu1 %1124 }
 0x3bf   :  { %v1117_v5 = vsub.f32 %v2205_v35, %v1116_v15 }
 0x3c1   :  { %v1631_v16 = vpop.eup %1630  ;;  %v1118_v18 = vmul.f32 1.442695, %v1117_v5 }
 0x3c2   :  { %v1012_v19 = vpop.permute.xlu0 %1011  ;;  %v902_v20 = vpack.c.bf16 %v1631_v16, %v1631_v16  ;;  %v899_v33 = vsel %vm444_vm3, %v1631_v16, 0.0  ;;  %v1620_v16 = vld [vmem:[#allocation12] sm:$0xff]  }
 0x3c3   :  { %1634 = vpow2.f32 %v1118_v18  ;;  %1585 = vmatpush3.bf16.msra.mxu1 %v1620_v16 }
 0x3c4   :  { %1545 = vmatmul.mubr.msk.bf16.vlgmr.msra.gmra.mrb[24].mxu0 %vm444_vm3, %v902_v20  ;;  %1636 = vpow2.f32 %v1231_v17  ;;  %1586 = vmatprep.subr.bf16.mxu1 %v1924_v0 }
 0x3c5   :  { %v1633_v21 = vpop.eup %1632  ;;  %1555 = vmatpush3.bf16.msra.mxu0 %v1012_v19  ;;  %1556 = vmatprep.mubr.msk.bf16.mxu0 %vm1925_vm0, %v1924_v0  ;;  %v1621_v19 = vld [vmem:[#allocation12 + $0x8] sm:$0xff]  }
 0x3c6   :  { %v1006_v22 = vsel %vm444_vm3, %v1633_v21, 0.0  ;;  %1566 = vmatprep.subr.bf16.mxu0 %v1924_v0  ;;  %v1009_v24 = vpack.c.bf16 %v1633_v21, %v1633_v21  ;;  %v1238_v32 = vpop.permute.xlu0 %1237 }
 0x3c7   :  { %1007 = vadd.xlane.f32.xlu1 %v1006_v22  ;;  %1587 = vmatpush3.bf16.msra.mxu1 %v1621_v19 }
 0x3cb   :  { %789 = vadd.xlane.f32.xlu1 %v788_v23 }
 0x3cc   :  { %1557 = vmatmul.mubr.msk.bf16.vlgmr.msra.gmra.mrb[28].mxu0 %vm444_vm3, %v1009_v24 }
 0x3cd   :  { %v1635_v26 = vpop.eup %1634  ;;  %1567 = vmatpush3.bf16.msra.mxu0 %v1125_v25  ;;  %1568 = vmatprep.mubr.msk.bf16.mxu0 %vm1925_vm0, %v1924_v0 }
 0x3ce   :  { %v1120_v28 = vsel %vm444_vm3, %v1635_v26, 0.0  ;;  %1578 = vmatprep.subr.bf16.mxu0 %v1924_v0  ;;  %v1637_v29 = vpop.eup %1636  ;;  %v1123_v31 = vpack.c.bf16 %v1635_v26, %v1635_v26 }
 0x3cf   :  { %452 = vadd.xlane.f32.xlu1 %v451_v27  ;;  %1121 = vadd.xlane.f32.xlu0 %v1120_v28  ;;  %v1233_v30 = vsel %vm444_vm3, %v1637_v29, 0.0  ;;  %v1236_v34 = vpack.c.bf16 %v1637_v29, %v1637_v29 }
 0x3d3   :  { %1234 = vadd.xlane.f32.xlu0 %v1233_v30 }
 0x3d4   :  { %1569 = vmatmul.mubr.msk.bf16.vlgmr.msra.gmra.mrb[32].mxu0 %vm444_vm3, %v1123_v31 }
 0x3d5   :  { %1579 = vmatpush3.bf16.msra.mxu0 %v1238_v32  ;;  %1580 = vmatprep.mubr.msk.bf16.mxu0 %vm1925_vm0, %v1924_v0 }
 0x3d7   :  { %900 = vadd.xlane.f32.xlu0 %v899_v33 }
 0x3dc   :  { %1581 = vmatmul.mubr.msk.bf16.vlgmr.msra.gmra.mrb[36].mxu0 %vm444_vm3, %v1236_v34 }
 0x3ec   :  { %v492_v35 = vpop.f32.mrb[8].mxu0 }
 0x3ed   :  { %v1498_v36 = vpop.f32.mrb[9].mxu0 }
 0x3ee   :  { %v495_v37 = vpop.f32.mrb[10].mxu0 }
 0x3ef   :  { %v1499_v38 = vpop.f32.mrb[11].mxu0 }
 0x3f0   :  { %v1414_v38 = vld [vmem:[#allocation18] ss:$0 sm:$0xff] }
 0x417   :  { %v561_v40 = vpop.xlane.xlu0 %560 }
 0x418   :  { %1638 = vrcp.f32 %v561_v40 }
 0x41f   :  { %v676_v43 = vpop.xlane.xlu0 %675 }
 0x422   :  { %v1639_v44 = vpop.eup %1638 }
 0x454   :  { %v1008_v39 = vpop.xlane.xlu1 %1007 }
 0x458   :  { %v790_v41 = vpop.xlane.xlu1 %789 }
 0x45c   :  { %v453_v42 = vpop.xlane.xlu1 %452  ;;  %v1122_v1 = vpop.xlane.xlu0 %1121 }
 0x45d   :  { %1640 = vrcp.f32 %v453_v42 }
 0x45e   :  { %1642 = vrcp.f32 %v676_v43 }
 0x45f   :  { %1644 = vrcp.f32 %v790_v41 }
 0x460   :  { %v1235_v2 = vpop.xlane.xlu0 %1234 }
 0x464   :  { %v604_v45 = vpop.f32.mrb[12].mxu0  ;;  %v901_v3 = vpop.xlane.xlu0 %900 }
 0x465   :  { %v611_v46 = vmul.f32 %v1639_v44, %v604_v45  ;;  %v1510_v47 = vpop.f32.mrb[13].mxu0  ;;  %1646 = vrcp.f32 %v901_v3 }
 0x466   :  { %v607_v48 = vpop.f32.mrb[14].mxu0  ;;  %1648 = vrcp.f32 %v1008_v39 }
 0x467   :  { %v1641_v49 = vpop.eup %1640  ;;  %613 = vrot.lane.b32.xlu1 %v611_v46, %s1912_s24  ;;  %v1511_v50 = vpop.f32.mrb[15].mxu0  ;;  %1650 = vrcp.f32 %v1122_v1 }
 0x468   :  { %v499_v51 = vmul.f32 %v1641_v49, %v492_v35  ;;  %v1643_v52 = vpop.eup %1642  ;;  %1652 = vrcp.f32 %v1235_v2 }
 0x469   :  { %v1645_v58 = vpop.eup %1644 }
 0x46a   :  { %500 = vst.msk [vmem:[#allocation2] sm:$0xff] %vm397_vm2, %v499_v51 }
 0x46c   :  { %v718_v53 = vpop.f32.mrb[16].mxu0 }
 0x46d   :  { %v725_v54 = vmul.f32 %v1643_v52, %v718_v53  ;;  %v1522_v55 = vpop.f32.mrb[17].mxu0 }
 0x46e   :  { %v721_v56 = vpop.f32.mrb[18].mxu0 }
 0x46f   :  { %727 = vrot.lane.b32.xlu1 %v725_v54, %s1929_s26  ;;  %v1523_v57 = vpop.f32.mrb[19].mxu0  ;;  %v1647_v4 = vpop.eup %1646 }
 0x470   :  { %v1649_v11 = vpop.eup %1648 }
 0x471   :  { %v1651_v17 = vpop.eup %1650 }
 0x472   :  { %v1653_v24 = vpop.eup %1652 }
 0x474   :  { %v832_v59 = vpop.f32.mrb[20].mxu0 }
 0x475   :  { %v839_v60 = vmul.f32 %v1645_v58, %v832_v59  ;;  %v1534_v61 = vpop.f32.mrb[21].mxu0 }
 0x476   :  { %v835_v62 = vpop.f32.mrb[22].mxu0 }
 0x477   :  { %v1535_v63 = vpop.f32.mrb[23].mxu0 }
 0x497   :  { %v940_v6 = vpop.f32.mrb[24].mxu0 }
 0x498   :  { %v947_v7 = vmul.f32 %v1647_v4, %v940_v6  ;;  %v1546_v8 = vpop.f32.mrb[25].mxu0 }
 0x499   :  { %v943_v9 = vpop.f32.mrb[26].mxu0 }
 0x49a   :  { %948 = vst.msk [vmem:[#allocation2 + $0x8] sm:$0xff] %vm397_vm2, %v947_v7  ;;  %v1547_v10 = vpop.f32.mrb[27].mxu0 }
 0x49f   :  { %v1051_v12 = vpop.f32.mrb[28].mxu0 }
 0x4a0   :  { %v1058_v13 = vmul.f32 %v1649_v11, %v1051_v12  ;;  %v1558_v14 = vpop.f32.mrb[29].mxu0 }
 0x4a1   :  { %v1054_v15 = vpop.f32.mrb[30].mxu0 }
 0x4a2   :  { %1060 = vrot.lane.b32.xlu0 %v1058_v13, %s1912_s24  ;;  %v1559_v5 = vpop.f32.mrb[31].mxu0 }
 0x4a6   :  { %841 = vrot.lane.b32.xlu0 %v839_v60, %s1930_s28 }
 0x4a7   :  { %v1164_v18 = vpop.f32.mrb[32].mxu0 }
 0x4a8   :  { %v1171_v20 = vmul.f32 %v1651_v17, %v1164_v18  ;;  %v1570_v21 = vpop.f32.mrb[33].mxu0 }
 0x4a9   :  { %v1167_v22 = vpop.f32.mrb[34].mxu0 }
 0x4aa   :  { %1173 = vrot.lane.b32.xlu1 %v1171_v20, %s1929_s26  ;;  %v1571_v23 = vpop.f32.mrb[35].mxu0 }
 0x4af   :  { %v1277_v25 = vpop.f32.mrb[36].mxu0 }
 0x4b0   :  { %v1284_v26 = vmul.f32 %v1653_v24, %v1277_v25  ;;  %v1582_v27 = vpop.f32.mrb[37].mxu0 }
 0x4b1   :  { %v1280_v28 = vpop.f32.mrb[38].mxu0 }
 0x4b2   :  { %1286 = vrot.lane.b32.xlu1 %v1284_v26, %s1930_s28  ;;  %v1583_v29 = vpop.f32.mrb[39].mxu0 }
 0x4d9   :  { %v614_v30 = vpop.permute.xlu1 %613 }
 0x4da   :  { %617 = vst.msk [vmem:[#allocation2] sm:$0xff] %vm616_vm4, %v614_v30 }
 0x4e1   :  { %v728_v31 = vpop.permute.xlu1 %727 }
 0x4e2   :  { %731 = vst.msk [vmem:[#allocation2] sm:$0xff] %vm730_vm5, %v728_v31 }
 0x514   :  { %v1061_v32 = vpop.permute.xlu0 %1060 }
 0x515   :  { %1063 = vst.msk [vmem:[#allocation2 + $0x8] sm:$0xff] %vm616_vm4, %v1061_v32 }
 0x518   :  { %v842_v0 = vpop.permute.xlu0 %841 }
 0x519   :  { %845 = vst.msk [vmem:[#allocation2] sm:$0xff] %vm844_vm6, %v842_v0 }
 0x51c   :  { %v1174_v33 = vpop.permute.xlu1 %1173 }
 0x51d   :  { %1176 = vst.msk [vmem:[#allocation2 + $0x8] sm:$0xff] %vm730_vm5, %v1174_v33 }
 0x520   :  { %v1290_v35 = vld [vmem:[#allocation2] sm:$0xff] }
 0x524   :  { %v1287_v34 = vpop.permute.xlu1 %1286 }
 0x525   :  { %1289 = vst.msk [vmem:[#allocation2 + $0x8] sm:$0xff] %vm844_vm6, %v1287_v34 }
 0x52c   :  { %v1291_v36 = vld [vmem:[#allocation2 + $0x8] sm:$0xff] }
 0x52d   :  { %v1292_v37 = vpack.c.bf16 %v1291_v36, %v1290_v35 }
 0x52f   :  { %1589 = vmatmul.mubr.msk.bf16.vlgmr.msra.gmra.mrb[36].mxu1 %vm197_vm1, %v1292_v37 }
 0x602   :  { %v1353_v39 = vpop.f32.mrb[36].mxu1 }
 0x603   :  { %v1354_v40 = vadd.f32 %v1414_v38, %v1353_v39  ;;  %v1590_v41 = vpop.f32.mrb[37].mxu1 }
 0x604   :  { %v1356_v42 = vpop.f32.mrb[38].mxu1 }
 0x605   :  { %1360 = vst.msk [vmem:[#allocation20] sm:$0xff] %vm197_vm1, %v1354_v40  ;;  %v1357_v43 = vadd.f32 %v1414_v38, %v1356_v42  ;;  %v1591_v44 = vpop.f32.mrb[39].mxu1 }
 0x607   :  { %1361 = vst.msk [vmem:[#allocation20 + $0x8] sm:$0xff] %vm197_vm1, %v1357_v43 }
 0x608   :  { %1885 = shalt.err (!%p1882_p0)
}
 0x609   :  { %s1886_s16 = scalar_lea.hbm %s2305_s10, 256 }
 0x60a   :  { %p1887_p1 = scmp.ne.s32.totalorder %s2305_s10, %s1886_s16  ;;  %p1890_p2 = scmp.lt.u32.totalorder %s1886_s16, %s2305_s10 }
 0x60c   :  { %p1892_p3 = pnand %p1890_p2, %p1887_p1 }
 0x60e   :  { %1895 = shalt.err (!%p1892_p3)
}
 0x60f   :  { %1373 = dma.vmem_to_hbm [thread:$0]  %s1368_s17, 256, %s2305_s10, [#allocation5], %s1911_s23, %s1911_s23, %s1912_s24  }
 0x610   :  { %1908 = dma.done.wait [#allocation5], 256  }
 0x611   :  { %1909 = vsyncadd [#allocation5], 4294967040 }
 0x612   :  { %1377 = vsyncpa [#allocation4], 1 }
 0x613   :  { %1378 = vsyncpa [#allocation7], 1 }
 0x614   :  { %1379 = vsyncpa [#allocation10], 1 }
 0x615   :  { %1380 = vsyncpa [#allocation13], 1 }
 0x616   :  { %1381 = vsyncpa [#allocation16], 1 }
 0x617   :  { %1382 = vsyncpa [#allocation19], 1 }
 0x618   :  { %1383 = vsyncpa [#allocation5], 1 }

</bundles_post_ra>
